<compile_context>
chip_gen: v7x
topology: tpu7x:2x2x1
jax: 0.10.0
libtpu: 0.0.40
codegen_flags: <defaults>
</compile_context>

<pallas_src>
import functools
import math

import jax
import jax.numpy as jnp
from jax.experimental import pallas as pl
from jax.experimental.pallas import tpu as pltpu


# ----------------------------- math helpers (f32) ---------------------------

def _layernorm(x, w, b, eps=1e-5):
    mu = jnp.mean(x, axis=-1, keepdims=True)
    var = jnp.mean((x - mu) ** 2, axis=-1, keepdims=True)
    return (x - mu) * jax.lax.rsqrt(var + eps) * w + b


def _gelu_tanh(x):
    # GELU(approximate='tanh') exactly as PyTorch computes it.
    c = 0.7978845608028654  # sqrt(2/pi)
    return 0.5 * x * (1.0 + jnp.tanh(c * (x + 0.044715 * x * x * x)))


# ----------------------- kernel 1: ln_1 + fused QKV proj --------------------

def qkv_kernel(x_ref, ln1w_ref, ln1b_ref, wattn_ref, battn_ref, qkv_ref):
    x = x_ref[0].astype(jnp.float32)                       # (tq, C)
    h1 = _layernorm(x, ln1w_ref[0], ln1b_ref[0])           # f32 stats
    qkv = jnp.dot(h1.astype(jnp.bfloat16), wattn_ref[...],
                  preferred_element_type=jnp.float32)      # bf16 x bf16 -> f32
    qkv = qkv + battn_ref[0]                               # 1/sqrt(hd) folded into Q cols
    qkv_ref[0] = qkv.astype(qkv_ref.dtype)                 # bf16 store


# --------- kernel 2: flash attention + c_proj + residual + ln_2 + MLP -------

def attn_mlp_kernel(x_ref, q_ref, k_ref, v_ref,
                    wproj_ref, bproj_ref, ln2w_ref, ln2b_ref,
                    wfc_ref, bfc_ref, wmlp_ref, bmlp_ref,
                    out_ref,
                    m_scr, l_scr, acc_scr,
                    *, n_head, tq, tk, hidden_tile, skip_mlp):
    qi = pl.program_id(1)
    ki = pl.program_id(2)
    nk = pl.num_programs(2)

    hd = q_ref.shape[-1]
    C = n_head * hd

    @pl.when(ki == 0)
    def _init():
        m_scr[...] = jnp.full_like(m_scr, -jnp.inf)
        l_scr[...] = jnp.zeros_like(l_scr)
        acc_scr[...] = jnp.zeros_like(acc_scr)

    def _scores():
        # (H, tq, tk) f32.  Q was pre-scaled by 1/sqrt(hd) via the weights.
        return jax.lax.dot_general(
            q_ref[...], k_ref[...], (((2,), (2,)), ((0,), (0,))),
            preferred_element_type=jnp.float32)

    def _online_update(s):
        m_prev = m_scr[...]
        m_new = jnp.maximum(m_prev, jnp.max(s, axis=-1, keepdims=True))
        alpha = jnp.exp(m_prev - m_new)
        p = jnp.exp(s - m_new)                             # f32 softmax numerator
        l_scr[...] = alpha * l_scr[...] + jnp.sum(p, axis=-1, keepdims=True)
        pv = jax.lax.dot_general(
            p.astype(jnp.bfloat16), v_ref[...], (((2,), (1,)), ((0,), (0,))),
            preferred_element_type=jnp.float32)            # (H, tq, hd)
        acc_scr[...] = alpha * acc_scr[...] + pv
        m_scr[...] = m_new

    @pl.when(ki < qi)               # strictly below the diagonal: mask-free path
    def _below_diag():
        _online_update(_scores())

    @pl.when(ki == qi)              # diagonal tile: static triangular mask (tq == tk)
    def _diag():
        s = _scores()
        row = jax.lax.broadcasted_iota(jnp.int32, (tq, tk), 0)
        col = jax.lax.broadcasted_iota(jnp.int32, (tq, tk), 1)
        s = jnp.where((col <= row)[None, :, :], s, -1e30)
        _online_update(s)
    # ki > qi: fully-masked tile -> no compute (and no new K/V DMA; the K/V
    # index_map clamps to min(ki, qi)).

    @pl.when(ki == nk - 1)
    def _finalize():
        y = acc_scr[...] * pl.reciprocal(l_scr[...], approx=True)  # (H, tq, hd) f32

        # c_proj as a sum of per-head (tq, hd) @ (hd, C) matmuls.
        # TODO(synk): a single K=C matmul would use the full MXU depth but
        # needs an (H,tq,hd)->(tq,C) relayout Mosaic cannot lower cheaply for
        # hd=64; keep the per-head form for lowering safety.
        attn_out = jnp.zeros((tq, C), jnp.float32)
        for h in range(n_head):
            attn_out = attn_out + jnp.dot(
                y[h].astype(jnp.bfloat16), wproj_ref[h * hd:(h + 1) * hd, :],
                preferred_element_type=jnp.float32)
        attn_out = attn_out + bproj_ref[0]

        x1 = x_ref[0].astype(jnp.float32) + attn_out       # first residual (f32)

        if skip_mlp:
            out_ref[0] = x1.astype(out_ref.dtype)
        else:
            h2 = _layernorm(x1, ln2w_ref[0], ln2b_ref[0]).astype(jnp.bfloat16)
            h4 = wfc_ref.shape[1]
            n_tiles = h4 // hidden_tile

            def mlp_tile(lo, acc):
                # Bias + GELU fused per hidden tile; the full (tq, 4C)
                # intermediate never exists.
                a = jnp.dot(h2, wfc_ref[:, pl.ds(lo, hidden_tile)],
                            preferred_element_type=jnp.float32)
                a = a + bfc_ref[:, pl.ds(lo, hidden_tile)]
                a = _gelu_tanh(a).astype(jnp.bfloat16)     # GELU in f32, cast at matmul
                return acc + jnp.dot(a, wmlp_ref[pl.ds(lo, hidden_tile), :],
                                     preferred_element_type=jnp.float32)

            mlp = jnp.zeros((tq, C), jnp.float32)
            if n_tiles <= 4:
                # Small trip count: static unroll (static slices, known-safe).
                for t in range(n_tiles):
                    mlp = mlp_tile(t * hidden_tile, mlp)
            else:
                # Large C: visible loop keeps vreg live ranges bounded.
                def body(t, acc):
                    lo = pl.multiple_of(t * hidden_tile, hidden_tile)
                    return mlp_tile(lo, acc)
                mlp = jax.lax.fori_loop(0, n_tiles, body, mlp)
            mlp = mlp + bmlp_ref[0]
            out_ref[0] = (x1 + mlp).astype(out_ref.dtype)  # second residual


# --------------------------------- wrapper ----------------------------------

def _nbytes(shape, dtype):
    return int(math.prod(shape)) * jnp.dtype(dtype).itemsize


def _pick_hidden_tile(h4):
    if h4 <= 1024:
        return h4
    for cand in (1024, 512, 384, 256, 128):
        if h4 % cand == 0:
            return cand
    return h4


def _vmem_limit(est_bytes):
    """Generation-aware VMEM limit: ~90% of physical VMEM (64 MiB on v7x,
    128 MiB on v5e/v6e), never below the 32 MiB default scoped limit."""
    try:
        cap = int(pltpu.get_tpu_info().vmem_capacity_bytes)
    except Exception:
        cap = 64 << 20                                     # conservative (v7x)
    budget = int(min(cap, 128 << 20) * 0.9)
    est = int(est_bytes * 1.25) + (4 << 20)                # relayout / spill headroom
    return max(32 << 20, min(est, budget))


def _const_spec(block_shape, index_map, single_buffer):
    """BlockSpec for grid-constant operands (same block every grid step).
    Single-buffering halves their VMEM footprint with zero pipelining loss."""
    if single_buffer and hasattr(pl, "Buffered"):
        try:
            return pl.BlockSpec(block_shape, index_map,
                                pipeline_mode=pl.Buffered(1))
        except Exception:
            pass
    return pl.BlockSpec(block_shape, index_map)


def _gpt2_block_impl(x, params, n_head, seq_tile, skip_mlp, single_buffer):
    B, T, C = x.shape
    (ln1w, ln1b, wattn, battn, wproj, bproj,
     ln2w, ln2b, wfc, bfc, wmlp, bmlp) = params
    assert C % n_head == 0
    hd = C // n_head
    tq = min(seq_tile, T)
    assert T % tq == 0, "T must be a multiple of the sequence tile"
    nt = T // tq
    bf16 = jnp.bfloat16
    wmult = 1 if single_buffer else 2

    # Fold the attention scale 1/sqrt(hd) into the Q columns of c_attn so the
    # flash inner loop has no per-tile score multiply.
    qscale = jnp.concatenate([jnp.full((C,), 1.0 / math.sqrt(hd), jnp.float32),
                              jnp.ones((2 * C,), jnp.float32)])
    wattn_b = (wattn * qscale[None, :]).astype(bf16)
    battn_s = battn * qscale[None, :]
    wproj_b = wproj.astype(bf16)
    wfc_b = wfc.astype(bf16)
    wmlp_b = wmlp.astype(bf16)

    # ---------------- pass 1: ln_1 + fused QKV projection -------------------
    est1 = (2 * (_nbytes((1, tq, C), x.dtype) + _nbytes((1, tq, 3 * C), bf16))
            + wmult * (_nbytes((C, 3 * C), bf16) + _nbytes((1, 3 * C), jnp.float32)
                       + 2 * _nbytes((1, C), jnp.float32))
            + 2 * _nbytes((tq, 3 * C), jnp.float32))       # in-kernel temporaries
    qkv = pl.pallas_call(
        qkv_kernel,
        out_shape=jax.ShapeDtypeStruct((B, T, 3 * C), bf16),
        grid_spec=pltpu.PrefetchScalarGridSpec(
            num_scalar_prefetch=0,
            grid=(B, nt),
            in_specs=[
                pl.BlockSpec((1, tq, C), lambda b, i: (b, i, 0)),
                _const_spec((1, C), lambda b, i: (0, 0), single_buffer),
                _const_spec((1, C), lambda b, i: (0, 0), single_buffer),
                _const_spec((C, 3 * C), lambda b, i: (0, 0), single_buffer),
                _const_spec((1, 3 * C), lambda b, i: (0, 0), single_buffer),
            ],
            out_specs=pl.BlockSpec((1, tq, 3 * C), lambda b, i: (b, i, 0)),
        ),
        compiler_params=pltpu.CompilerParams(
            dimension_semantics=("parallel", "parallel"),
            vmem_limit_bytes=_vmem_limit(est1)),
    )(x, ln1w, ln1b, wattn_b, battn_s)

    # Head split (token-major -> head-major) done once in the wrapper.
    # TODO(synk): emitting head-major q/k/v straight from pass 1 would save an
    # HBM round-trip but needs a (tq, H*hd)->(H, tq, hd) relayout that Mosaic
    # cannot lower cheaply for hd=64; kept as an XLA transpose.
    qkv = qkv.reshape(B, T, 3, n_head, hd)
    q = jnp.transpose(qkv[:, :, 0], (0, 2, 1, 3)).reshape(B * n_head, T, hd)
    k = jnp.transpose(qkv[:, :, 1], (0, 2, 1, 3)).reshape(B * n_head, T, hd)
    v = jnp.transpose(qkv[:, :, 2], (0, 2, 1, 3)).reshape(B * n_head, T, hd)

    # ---------------- pass 2: flash attention + proj + ln_2 + MLP -----------
    # TODO(synk): for C >= ~1280 on v7x, split c_proj+LN2+MLP into a third
    # pallas_call with a hidden-dim grid axis so wfc/wmlp are streamed (and
    # optionally fp8 on v7x) instead of held VMEM-resident.
    hidden_tile = _pick_hidden_tile(4 * C)
    lane_hd = max(hd, 128)
    est2 = (2 * (2 * _nbytes((1, tq, C), x.dtype)                      # x + out blocks
                 + 3 * _nbytes((n_head, tq, lane_hd), bf16))           # q/k/v blocks
            + wmult * (_nbytes((C, C), bf16) + _nbytes((C, 4 * C), bf16)
                       + _nbytes((4 * C, C), bf16)
                       + _nbytes((10 * C,), jnp.float32))              # biases + ln params
            + 2 * _nbytes((n_head, tq, 128), jnp.float32)              # m, l scratch
            + _nbytes((n_head, tq, lane_hd), jnp.float32)              # acc scratch
            + 2 * _nbytes((n_head, tq, tq), jnp.float32)               # s, p temporaries
            + 2 * _nbytes((tq, hidden_tile), jnp.float32)              # MLP temporaries
            + 3 * _nbytes((tq, C), jnp.float32))                       # attn_out/x1/mlp acc

    kernel = functools.partial(
        attn_mlp_kernel, n_head=n_head, tq=tq, tk=tq,
        hidden_tile=hidden_tile, skip_mlp=skip_mlp)

    out = pl.pallas_call(
        kernel,
        out_shape=jax.ShapeDtypeStruct((B, T, C), x.dtype),
        grid_spec=pltpu.PrefetchScalarGridSpec(
            num_scalar_prefetch=0,
            grid=(B, nt, nt),
            in_specs=[
                pl.BlockSpec((1, tq, C), lambda b, i, j: (b, i, 0)),            # x
                pl.BlockSpec((n_head, tq, hd), lambda b, i, j: (b, i, 0)),      # q
                # K/V index clamped to min(j, i): fully-masked (skipped) tiles
                # reuse the previous block -> no wasted DMA bandwidth.
                pl.BlockSpec((n_head, tq, hd),
                             lambda b, i, j: (b, jnp.minimum(j, i), 0)),        # k
                pl.BlockSpec((n_head, tq, hd),
                             lambda b, i, j: (b, jnp.minimum(j, i), 0)),        # v
                _const_spec((C, C), lambda b, i, j: (0, 0), single_buffer),     # wproj
                _const_spec((1, C), lambda b, i, j: (0, 0), single_buffer),     # bproj
                _const_spec((1, C), lambda b, i, j: (0, 0), single_buffer),     # ln2w
                _const_spec((1, C), lambda b, i, j: (0, 0), single_buffer),     # ln2b
                _const_spec((C, 4 * C), lambda b, i, j: (0, 0), single_buffer), # wfc
                _const_spec((1, 4 * C), lambda b, i, j: (0, 0), single_buffer), # bfc
                _const_spec((4 * C, C), lambda b, i, j: (0, 0), single_buffer), # wmlp
                _const_spec((1, C), lambda b, i, j: (0, 0), single_buffer),     # bmlp
            ],
            out_specs=pl.BlockSpec((1, tq, C), lambda b, i, j: (b, i, 0)),
            scratch_shapes=[
                pltpu.VMEM((n_head, tq, 1), jnp.float32),   # running max m
                pltpu.VMEM((n_head, tq, 1), jnp.float32),   # running sum l
                pltpu.VMEM((n_head, tq, hd), jnp.float32),  # output accumulator
            ],
        ),
        compiler_params=pltpu.CompilerParams(
            dimension_semantics=("parallel", "parallel", "arbitrary"),
            vmem_limit_bytes=_vmem_limit(est2)),
    )(x, q, k, v, wproj_b, bproj, ln2w, ln2b, wfc_b, bfc, wmlp_b, bmlp)
    return out


def gpt2_block(x, params, n_head, *, seq_tile=128, skip_mlp=False):
    """GPT-2 Block forward.  Tries single-buffered weight specs first and
    falls back to plain specs if this jax/Mosaic version rejects
    pipeline_mode (identical math either way)."""
    try:
        return _gpt2_block_impl(x, params, n_head, seq_tile, skip_mlp, True)
    except Exception:
        return _gpt2_block_impl(x, params, n_head, seq_tile, skip_mlp, False)


# ------------------------------ params & reference --------------------------

def init_params(key, C):
    """Deterministic synthetic parameters (shapes match the PyTorch module)."""
    ks = jax.random.split(key, 8)
    s = 0.02
    # Linear weights stored pre-transposed as (in, out); biases as (1, out).
    wattn = jax.random.normal(ks[0], (C, 3 * C), jnp.float32) * s
    battn = jax.random.normal(ks[1], (1, 3 * C), jnp.float32) * s
    wproj = jax.random.normal(ks[2], (C, C), jnp.float32) * s
    bproj = jax.random.normal(ks[3], (1, C), jnp.float32) * s
    wfc = jax.random.normal(ks[4], (C, 4 * C), jnp.float32) * s
    bfc = jax.random.normal(ks[5], (1, 4 * C), jnp.float32) * s
    wmlp = jax.random.normal(ks[6], (4 * C, C), jnp.float32) * s
    bmlp = jax.random.normal(ks[7], (1, C), jnp.float32) * s
    ln1w = jnp.ones((1, C), jnp.float32)
    ln1b = jnp.zeros((1, C), jnp.float32)
    ln2w = jnp.ones((1, C), jnp.float32)
    ln2b = jnp.zeros((1, C), jnp.float32)
    return (ln1w, ln1b, wattn, battn, wproj, bproj,
            ln2w, ln2b, wfc, bfc, wmlp, bmlp)


def reference_block(x, params, n_head):
    """Pure-JAX f32 reference for correctness checking."""
    (ln1w, ln1b, wattn, battn, wproj, bproj,
     ln2w, ln2b, wfc, bfc, wmlp, bmlp) = params
    B, T, C = x.shape
    hd = C // n_head

    def ln(v, w, b):
        mu = jnp.mean(v, -1, keepdims=True)
        var = jnp.mean((v - mu) ** 2, -1, keepdims=True)
        return (v - mu) / jnp.sqrt(var + 1e-5) * w + b

    h1 = ln(x, ln1w[0], ln1b[0])
    qkv = h1 @ wattn + battn[0]
    q, k, v = jnp.split(qkv, 3, axis=-1)
    q = q.reshape(B, T, n_head, hd).transpose(0, 2, 1, 3)
    k = k.reshape(B, T, n_head, hd).transpose(0, 2, 1, 3)
    v = v.reshape(B, T, n_head, hd).transpose(0, 2, 1, 3)
    s = jnp.einsum('bhqd,bhkd->bhqk', q, k) / (hd ** 0.5)
    mask = jnp.tril(jnp.ones((T, T), bool))
    s = jnp.where(mask, s, -1e30)
    p = jax.nn.softmax(s, axis=-1)
    y = jnp.einsum('bhqk,bhkd->bhqd', p, v).transpose(0, 2, 1, 3).reshape(B, T, C)
    x1 = x + (y @ wproj + bproj[0])
    h2 = ln(x1, ln2w[0], ln2b[0])
    a = h2 @ wfc + bfc[0]
    a = 0.5 * a * (1.0 + jnp.tanh(0.7978845608028654 * (a + 0.044715 * a ** 3)))
    return x1 + (a @ wmlp + bmlp[0])


if __name__ == "__main__":
    # Lane-dense small test config (C multiple of 128, hd=64 like real GPT-2).
    B, T, C, n_head = 2, 256, 128, 2
    key = jax.random.PRNGKey(0)
    kx, kp = jax.random.split(key)
    x = jax.random.normal(kx, (B, T, C), jnp.float32)
    params = init_params(kp, C)

    out = gpt2_block(x, params, n_head, seq_tile=128)
    out = jax.block_until_ready(out)

    ref = reference_block(x, params, n_head)
    assert out.shape == (B, T, C)
    max_err = float(jnp.max(jnp.abs(out - ref)))
    assert jnp.allclose(out, ref, atol=2e-2, rtol=2e-2), \
        f"mismatch vs reference (max abs err {max_err})"
    print("KERNEL_OK")
</pallas_src>

<mosaic_0001>
module attributes {stable_mosaic.version = 11 : i64} {
  func.func @qkv_kernel(%arg0: i32, %arg1: i32, %arg2: memref<1x128x128xf32, #tpu.memory_space<vmem>>, %arg3: memref<1x128xf32, #tpu.memory_space<vmem>>, %arg4: memref<1x128xf32, #tpu.memory_space<vmem>>, %arg5: memref<128x384xbf16, #tpu.memory_space<vmem>>, %arg6: memref<1x384xf32, #tpu.memory_space<vmem>>, %arg7: memref<1x128x384xbf16, #tpu.memory_space<vmem>>) attributes {dimension_semantics = [#tpu.dimension_semantics<parallel>, #tpu.dimension_semantics<parallel>], iteration_bounds = array<i64: 2, 2>, scalar_prefetch = 0 : i64, scratch_operands = 0 : i64, tpu.core_type = #tpu.core_type<tc>, window_params = [{transform_indices = @transform_0, window_bounds = array<i64: 1, 128, 128>}, {pipeline_mode = #tpu.pipeline_mode<synchronous>, transform_indices = @transform_1, window_bounds = array<i64: 1, 128>}, {pipeline_mode = #tpu.pipeline_mode<synchronous>, transform_indices = @transform_2, window_bounds = array<i64: 1, 128>}, {pipeline_mode = #tpu.pipeline_mode<synchronous>, transform_indices = @transform_3, window_bounds = array<i64: 128, 384>}, {pipeline_mode = #tpu.pipeline_mode<synchronous>, transform_indices = @transform_4, window_bounds = array<i64: 1, 384>}, {transform_indices = @transform_5, window_bounds = array<i64: 1, 128, 384>}]} {
    %c0 = arith.constant 0 : index
    %c0_0 = arith.constant 0 : index
    %c0_1 = arith.constant 0 : index
    %0 = vector.load %arg2[%c0, %c0_0, %c0_1] : memref<1x128x128xf32, #tpu.memory_space<vmem>>, vector<1x128x128xf32>
    %1 = vector.shape_cast %0 : vector<1x128x128xf32> to vector<128x128xf32>
    %c0_2 = arith.constant 0 : index
    %c0_3 = arith.constant 0 : index
    %2 = vector.load %arg3[%c0_2, %c0_3] : memref<1x128xf32, #tpu.memory_space<vmem>>, vector<1x128xf32>
    %3 = vector.shape_cast %2 : vector<1x128xf32> to vector<128xf32>
    %c0_4 = arith.constant 0 : index
    %c0_5 = arith.constant 0 : index
    %4 = vector.load %arg4[%c0_4, %c0_5] : memref<1x128xf32, #tpu.memory_space<vmem>>, vector<1x128xf32>
    %5 = vector.shape_cast %4 : vector<1x128xf32> to vector<128xf32>
    %cst = arith.constant dense<0.000000e+00> : vector<128xf32>
    %6 = vector.multi_reduction <add>, %1, %cst [1] : vector<128x128xf32> to vector<128xf32>
    %7 = vector.shape_cast %6 : vector<128xf32> to vector<128x1xf32>
    %cst_6 = arith.constant 1.280000e+02 : f32
    %8 = vector.broadcast %cst_6 : f32 to vector<128x1xf32>
    %9 = arith.divf %7, %8 : vector<128x1xf32>
    %10 = vector.broadcast %9 : vector<128x1xf32> to vector<128x128xf32>
    %11 = arith.subf %1, %10 : vector<128x128xf32>
    %12 = arith.mulf %11, %11 : vector<128x128xf32>
    %cst_7 = arith.constant dense<0.000000e+00> : vector<128xf32>
    %13 = vector.multi_reduction <add>, %12, %cst_7 [1] : vector<128x128xf32> to vector<128xf32>
    %14 = vector.shape_cast %13 : vector<128xf32> to vector<128x1xf32>
    %cst_8 = arith.constant 1.280000e+02 : f32
    %15 = vector.broadcast %cst_8 : f32 to vector<128x1xf32>
    %16 = arith.divf %14, %15 : vector<128x1xf32>
    %17 = vector.broadcast %9 : vector<128x1xf32> to vector<128x128xf32>
    %18 = arith.subf %1, %17 : vector<128x128xf32>
    %cst_9 = arith.constant 9.99999974E-6 : f32
    %19 = vector.broadcast %cst_9 : f32 to vector<128x1xf32>
    %20 = arith.addf %16, %19 : vector<128x1xf32>
    %21 = math.rsqrt %20 : vector<128x1xf32>
    %22 = vector.broadcast %21 : vector<128x1xf32> to vector<128x128xf32>
    %23 = arith.mulf %18, %22 : vector<128x128xf32>
    %24 = vector.shape_cast %3 : vector<128xf32> to vector<1x128xf32>
    %25 = vector.broadcast %24 : vector<1x128xf32> to vector<128x128xf32>
    %26 = arith.mulf %23, %25 : vector<128x128xf32>
    %27 = vector.shape_cast %5 : vector<128xf32> to vector<1x128xf32>
    %28 = vector.broadcast %27 : vector<1x128xf32> to vector<128x128xf32>
    %29 = arith.addf %26, %28 : vector<128x128xf32>
    %30 = arith.truncf %29 : vector<128x128xf32> to vector<128x128xbf16>
    %c0_10 = arith.constant 0 : index
    %c0_11 = arith.constant 0 : index
    %31 = vector.load %arg5[%c0_10, %c0_11] : memref<128x384xbf16, #tpu.memory_space<vmem>>, vector<128x384xbf16>
    %cst_12 = arith.constant dense<0.000000e+00> : vector<128x384xf32>
    %32 = tpu.matmul %30, %31, %cst_12 {dimension_numbers = #tpu.dot_dimension_numbers<[1], [0], [0], [1], [0, 0, 1, 1], [], []>} : vector<128x128xbf16>, vector<128x384xbf16>, vector<128x384xf32> -> vector<128x384xf32>
    %c0_13 = arith.constant 0 : index
    %c0_14 = arith.constant 0 : index
    %33 = vector.load %arg6[%c0_13, %c0_14] : memref<1x384xf32, #tpu.memory_space<vmem>>, vector<1x384xf32>
    %34 = vector.shape_cast %33 : vector<1x384xf32> to vector<384xf32>
    %35 = vector.shape_cast %34 : vector<384xf32> to vector<1x384xf32>
    %36 = vector.broadcast %35 : vector<1x384xf32> to vector<128x384xf32>
    %37 = arith.addf %32, %36 : vector<128x384xf32>
    %38 = arith.truncf %37 : vector<128x384xf32> to vector<128x384xbf16>
    %c0_15 = arith.constant 0 : index
    %c0_16 = arith.constant 0 : index
    %c0_17 = arith.constant 0 : index
    %39 = vector.load %arg7[%c0_15, %c0_16, %c0_17] : memref<1x128x384xbf16, #tpu.memory_space<vmem>>, vector<1x128x384xbf16>
    %40 = vector.shape_cast %39 : vector<1x128x384xbf16> to vector<128x384xbf16>
    %41 = vector.shape_cast %38 : vector<128x384xbf16> to vector<1x128x384xbf16>
    tpu.vector_store %arg7[%c0_15, %c0_16, %c0_17], %41 {strides = array<i32>} : memref<1x128x384xbf16, #tpu.memory_space<vmem>>, vector<1x128x384xbf16>,
    return
  }
  func.func @transform_0(%arg0: i32, %arg1: i32) -> (i32, i32, i32) {
    %c0_i32 = arith.constant 0 : i32
    %c0_i32_0 = arith.constant 0 : i32
    return %arg0, %arg1, %c0_i32 : i32, i32, i32
  }
  func.func @transform_1(%arg0: i32, %arg1: i32) -> (i32, i32) {
    %c0_i32 = arith.constant 0 : i32
    %c0_i32_0 = arith.constant 0 : i32
    %c0_i32_1 = arith.constant 0 : i32
    return %c0_i32, %c0_i32_0 : i32, i32
  }
  func.func @transform_2(%arg0: i32, %arg1: i32) -> (i32, i32) {
    %c0_i32 = arith.constant 0 : i32
    %c0_i32_0 = arith.constant 0 : i32
    %c0_i32_1 = arith.constant 0 : i32
    return %c0_i32, %c0_i32_0 : i32, i32
  }
  func.func @transform_3(%arg0: i32, %arg1: i32) -> (i32, i32) {
    %c0_i32 = arith.constant 0 : i32
    %c0_i32_0 = arith.constant 0 : i32
    %c0_i32_1 = arith.constant 0 : i32
    return %c0_i32, %c0_i32_0 : i32, i32
  }
  func.func @transform_4(%arg0: i32, %arg1: i32) -> (i32, i32) {
    %c0_i32 = arith.constant 0 : i32
    %c0_i32_0 = arith.constant 0 : i32
    %c0_i32_1 = arith.constant 0 : i32
    return %c0_i32, %c0_i32_0 : i32, i32
  }
  func.func @transform_5(%arg0: i32, %arg1: i32) -> (i32, i32, i32) {
    %c0_i32 = arith.constant 0 : i32
    %c0_i32_0 = arith.constant 0 : i32
    return %arg0, %arg1, %c0_i32 : i32, i32, i32
  }
}

module attributes {stable_mosaic.version = 11 : i64} {
  func.func @qkv_kernel(%arg0: i32, %arg1: i32, %arg2: memref<1x128x128xf32, #tpu.memory_space<vmem>>, %arg3: memref<1x128xf32, #tpu.memory_space<vmem>>, %arg4: memref<1x128xf32, #tpu.memory_space<vmem>>, %arg5: memref<128x384xbf16, #tpu.memory_space<vmem>>, %arg6: memref<1x384xf32, #tpu.memory_space<vmem>>, %arg7: memref<1x128x384xbf16, #tpu.memory_space<vmem>>) attributes {dimension_semantics = [#tpu.dimension_semantics<parallel>, #tpu.dimension_semantics<parallel>], iteration_bounds = array<i64: 2, 2>, scalar_prefetch = 0 : i64, scratch_operands = 0 : i64, tpu.core_type = #tpu.core_type<tc>, window_params = [{transform_indices = @transform_0, window_bounds = array<i64: 1, 128, 128>}, {pipeline_mode = #tpu.pipeline_mode<synchronous>, transform_indices = @transform_1, window_bounds = array<i64: 1, 128>}, {pipeline_mode = #tpu.pipeline_mode<synchronous>, transform_indices = @transform_2, window_bounds = array<i64: 1, 128>}, {pipeline_mode = #tpu.pipeline_mode<synchronous>, transform_indices = @transform_3, window_bounds = array<i64: 128, 384>}, {pipeline_mode = #tpu.pipeline_mode<synchronous>, transform_indices = @transform_4, window_bounds = array<i64: 1, 384>}, {transform_indices = @transform_5, window_bounds = array<i64: 1, 128, 384>}]} {
    %c0 = arith.constant 0 : index
    %c0_0 = arith.constant 0 : index
    %c0_1 = arith.constant 0 : index
    %0 = vector.load %arg2[%c0, %c0_0, %c0_1] : memref<1x128x128xf32, #tpu.memory_space<vmem>>, vector<1x128x128xf32>
    %1 = vector.shape_cast %0 : vector<1x128x128xf32> to vector<128x128xf32>
    %c0_2 = arith.constant 0 : index
    %c0_3 = arith.constant 0 : index
    %2 = vector.load %arg3[%c0_2, %c0_3] : memref<1x128xf32, #tpu.memory_space<vmem>>, vector<1x128xf32>
    %3 = vector.shape_cast %2 : vector<1x128xf32> to vector<128xf32>
    %c0_4 = arith.constant 0 : index
    %c0_5 = arith.constant 0 : index
    %4 = vector.load %arg4[%c0_4, %c0_5] : memref<1x128xf32, #tpu.memory_space<vmem>>, vector<1x128xf32>
    %5 = vector.shape_cast %4 : vector<1x128xf32> to vector<128xf32>
    %cst = arith.constant dense<0.000000e+00> : vector<128xf32>
    %6 = vector.multi_reduction <add>, %1, %cst [1] : vector<128x128xf32> to vector<128xf32>
    %7 = vector.shape_cast %6 : vector<128xf32> to vector<128x1xf32>
    %cst_6 = arith.constant 1.280000e+02 : f32
    %8 = vector.broadcast %cst_6 : f32 to vector<128x1xf32>
    %9 = arith.divf %7, %8 : vector<128x1xf32>
    %10 = vector.broadcast %9 : vector<128x1xf32> to vector<128x128xf32>
    %11 = arith.subf %1, %10 : vector<128x128xf32>
    %12 = arith.mulf %11, %11 : vector<128x128xf32>
    %cst_7 = arith.constant dense<0.000000e+00> : vector<128xf32>
    %13 = vector.multi_reduction <add>, %12, %cst_7 [1] : vector<128x128xf32> to vector<128xf32>
    %14 = vector.shape_cast %13 : vector<128xf32> to vector<128x1xf32>
    %cst_8 = arith.constant 1.280000e+02 : f32
    %15 = vector.broadcast %cst_8 : f32 to vector<128x1xf32>
    %16 = arith.divf %14, %15 : vector<128x1xf32>
    %17 = vector.broadcast %9 : vector<128x1xf32> to vector<128x128xf32>
    %18 = arith.subf %1, %17 : vector<128x128xf32>
    %cst_9 = arith.constant 9.99999974E-6 : f32
    %19 = vector.broadcast %cst_9 : f32 to vector<128x1xf32>
    %20 = arith.addf %16, %19 : vector<128x1xf32>
    %21 = math.rsqrt %20 : vector<128x1xf32>
    %22 = vector.broadcast %21 : vector<128x1xf32> to vector<128x128xf32>
    %23 = arith.mulf %18, %22 : vector<128x128xf32>
    %24 = vector.shape_cast %3 : vector<128xf32> to vector<1x128xf32>
    %25 = vector.broadcast %24 : vector<1x128xf32> to vector<128x128xf32>
    %26 = arith.mulf %23, %25 : vector<128x128xf32>
    %27 = vector.shape_cast %5 : vector<128xf32> to vector<1x128xf32>
    %28 = vector.broadcast %27 : vector<1x128xf32> to vector<128x128xf32>
    %29 = arith.addf %26, %28 : vector<128x128xf32>
    %30 = arith.truncf %29 : vector<128x128xf32> to vector<128x128xbf16>
    %c0_10 = arith.constant 0 : index
    %c0_11 = arith.constant 0 : index
    %31 = vector.load %arg5[%c0_10, %c0_11] : memref<128x384xbf16, #tpu.memory_space<vmem>>, vector<128x384xbf16>
    %cst_12 = arith.constant dense<0.000000e+00> : vector<128x384xf32>
    %32 = tpu.matmul %30, %31, %cst_12 {dimension_numbers = #tpu.dot_dimension_numbers<[1], [0], [0], [1], [0, 0, 1, 1], [], []>} : vector<128x128xbf16>, vector<128x384xbf16>, vector<128x384xf32> -> vector<128x384xf32>
    %c0_13 = arith.constant 0 : index
    %c0_14 = arith.constant 0 : index
    %33 = vector.load %arg6[%c0_13, %c0_14] : memref<1x384xf32, #tpu.memory_space<vmem>>, vector<1x384xf32>
    %34 = vector.shape_cast %33 : vector<1x384xf32> to vector<384xf32>
    %35 = vector.shape_cast %34 : vector<384xf32> to vector<1x384xf32>
    %36 = vector.broadcast %35 : vector<1x384xf32> to vector<128x384xf32>
    %37 = arith.addf %32, %36 : vector<128x384xf32>
    %38 = arith.truncf %37 : vector<128x384xf32> to vector<128x384xbf16>
    %c0_15 = arith.constant 0 : index
    %c0_16 = arith.constant 0 : index
    %c0_17 = arith.constant 0 : index
    %39 = vector.load %arg7[%c0_15, %c0_16, %c0_17] : memref<1x128x384xbf16, #tpu.memory_space<vmem>>, vector<1x128x384xbf16>
    %40 = vector.shape_cast %39 : vector<1x128x384xbf16> to vector<128x384xbf16>
    %41 = vector.shape_cast %38 : vector<128x384xbf16> to vector<1x128x384xbf16>
    tpu.vector_store %arg7[%c0_15, %c0_16, %c0_17], %41 {strides = array<i32>} : memref<1x128x384xbf16, #tpu.memory_space<vmem>>, vector<1x128x384xbf16>,
    return
  }
  func.func @transform_0(%arg0: i32, %arg1: i32) -> (i32, i32, i32) {
    %c0_i32 = arith.constant 0 : i32
    %c0_i32_0 = arith.constant 0 : i32
    return %arg0, %arg1, %c0_i32 : i32, i32, i32
  }
  func.func @transform_1(%arg0: i32, %arg1: i32) -> (i32, i32) {
    %c0_i32 = arith.constant 0 : i32
    %c0_i32_0 = arith.constant 0 : i32
    %c0_i32_1 = arith.constant 0 : i32
    return %c0_i32, %c0_i32_0 : i32, i32
  }
  func.func @transform_2(%arg0: i32, %arg1: i32) -> (i32, i32) {
    %c0_i32 = arith.constant 0 : i32
    %c0_i32_0 = arith.constant 0 : i32
    %c0_i32_1 = arith.constant 0 : i32
    return %c0_i32, %c0_i32_0 : i32, i32
  }
  func.func @transform_3(%arg0: i32, %arg1: i32) -> (i32, i32) {
    %c0_i32 = arith.constant 0 : i32
    %c0_i32_0 = arith.constant 0 : i32
    %c0_i32_1 = arith.constant 0 : i32
    return %c0_i32, %c0_i32_0 : i32, i32
  }
  func.func @transform_4(%arg0: i32, %arg1: i32) -> (i32, i32) {
    %c0_i32 = arith.constant 0 : i32
    %c0_i32_0 = arith.constant 0 : i32
    %c0_i32_1 = arith.constant 0 : i32
    return %c0_i32, %c0_i32_0 : i32, i32
  }
  func.func @transform_5(%arg0: i32, %arg1: i32) -> (i32, i32, i32) {
    %c0_i32 = arith.constant 0 : i32
    %c0_i32_0 = arith.constant 0 : i32
    return %arg0, %arg1, %c0_i32 : i32, i32, i32
  }
}

</mosaic_0001>

<bundles_post_ra>
// kernel: tpu_custom_call.1
= control target key start
LH: loop header
LB: loop body
LE: loop exit
PB: predicated region body
PF: predicated region fallthrough
CT: control target
= control target key end

     0   :  { %s2262_s0 = inlined_call_operand.hbm [shape: f32[2,256,128], index: 0, kind: input, shape index: {}]   ;;  %s2263_s1 = inlined_call_operand.vmem [shape: f32[1,128], index: 1, kind: input, shape index: {}]   ;;  %s2264_s2 = inlined_call_operand.vmem [shape: f32[1,128], index: 2, kind: input, shape index: {}]   ;;  %s2265_s3 = inlined_call_operand.hbm [shape: bf16[128,384], index: 3, kind: input, shape index: {}]   ;;  %s2266_s4 = inlined_call_operand.vmem [shape: f32[1,384], index: 4, kind: input, shape index: {}]   ;;  %s2267_s5 = inlined_call_operand.hbm [shape: bf16[2,256,384], index: 5, kind: output, shape index: {}]  }
   0x1   :  { %2278 = sst [smem:[#allocation16_spill]] %s2265_s3 }
   0x2   :  { %2279 = sst [smem:[#allocation17_spill]] %s2267_s5 }
   0x3   :  { %10 = vsyncpa [#allocation3], 0 }
   0x4   :  { %12 = vsyncpa [#allocation3 + $0x1], 0 }
   0x5   :  { %13 = vsyncpa [#allocation6], 0 }
   0x6   :  { %14 = vsyncpa [#allocation4], 0 }
   0x7   :  { %16 = vsyncpa [#allocation4 + $0x1], 0  ;;  %s1742_s18 = smov 0   ;;  %s1744_s19 = smov 0  }
   0x8   :  { %s1746_s20 = smov 0   ;;  %s1748_s21 = smov 0  }
   0x9   :  { %s1750_s22 = smov 0   ;;  %s1752_s23 = smov 0  }
   0xa   :  { %s1754_s24 = smov 0   ;;  %s1756_s25 = smov 0  }
   0xb LB: > { %2280 = sst [smem:[#allocation11_spill]] %s1672_s18  ;;  %s1222_s26 = sadd.s32 4294967295, %s1700_s25   ;;  %s1700_s25 = sphi %s1756_s25, %s22_s25   ;;  %s1696_s24 = sphi %s1754_s24, %s2310_s24   ;;  %s1692_s23 = sphi %s1752_s23, %s2304_s23   ;;  %s1688_s22 = sphi %s1750_s22, %s2309_s22   ;;  %s1684_s21 = sphi %s1748_s21, %s2303_s21   ;;  %s1680_s20 = sphi %s1746_s20, %s2308_s20   ;;  %s1676_s19 = sphi %s1744_s19, %s2307_s19   ;;  %s1672_s18 = sphi %s1742_s18, %s2306_s18  }
   0xc   : > { %2281 = sst [smem:[#allocation12_spill]] %s1692_s23  ;;  %s1223_s27 = sadd.s32 4294967294, %s1700_s25  }
   0xd   : > { %p56_p0 = scmp.ne.s32.totalorder %s1676_s19, %s1672_s18  ;;  %p1786_p1 = scmp.eq.s32.totalorder %s1222_s26, 0 }
   0xe   : > { %p1790_p2 = scmp.eq.s32.totalorder %s1222_s26, 3  ;;  %p172_p3 = scmp.eq.s32.totalorder %s1223_s27, 3 }
   0xf   : > { %s2282_s28 = scalar_select %p1786_p1, 1, 0 }
  0x10   : > { %s2283_s29 = scalar_select %p1790_p2, 1, 0 }
  0x11   : > { %p1796_p4 = por %p1786_p1, %p56_p0  ;;  %p1224_p5 = scmp.ge.s32.totalorder %s1700_s25, 1 }
  0x12   : > { %p1801_p6 = por %p172_p3, %p56_p0  ;;  %p179_p7 = scmp.lt.s32.totalorder %s1700_s25, 5 }
  0x13   : > { %s2284_s30 = scalar_select %p1796_p4, 1, 0 }
  0x14   : > { %s2285_s6 = scalar_select %p1801_p6, 1, 0 }
  0x15   : > { %p1806_p8 = pnand %p1224_p5, %p179_p7  ;;  %s1702_s8 = smov [#allocation5]  }
  0x16   : > { %2286 = sst [smem:[#allocation13_spill]] %s2285_s6  ;;  %s197_s9 = sshll.u32 %s1702_s8, 4  ;;  %s198_s9 = int_to_ptr.vmem [resolvable:$true] %s197_s9 }
  0x17   : > { %s2287_s7 = scalar_select %p1806_p8, 1, 0 }
  0x18   : > { %p1388_p9 = pneg %p1806_p8  ;;  %s2289_s3 = sld [smem:[#allocation16_spill]] }
  0x1a   : > { %p1814_p10 = pnand %p1388_p9, %p1786_p1 }
  0x1c   : > { %p1542_p12 = pneg %p1814_p10 }
  0x1e   : > { %s1540_s13 = scalar_lea.hbm %s2289_s3, 3072 }
  0x1f   : > { %p1541_p11 = scmp.ne.s32.totalorder %s2289_s3, %s1540_s13  ;;  %p1547_p3 = scmp.lt.u32.totalorder %s1540_s13, %s2289_s3 }
  0x21   : > { %p1543_p13 = pnand %p1542_p12, %p1541_p11 }
  0x23   : > { %p1544_p0 = pneg %p1543_p13 }
  0x25   : > { %p1549_p5 = pnand %p1547_p3, %p1544_p0 }
  0x27   : > { %1552 = shalt.err (!%p1549_p5)
}
  0x28   : > { %s1553_s26 = scalar_lea.vmem %s198_s9, 3072  ;;  %p1561_p1 = scmp.lt.s32.totalorder %s198_s9, %s198_s9 }
  0x29   : > { %p1554_p7 = scmp.ne.s32.totalorder %s198_s9, %s1553_s26  ;;  %p1562_p4 = scmp.lt.s32.totalorder %s1553_s26, %s1553_s26 }
  0x2b   : > { %p1556_p9 = pnand %p1554_p7, %p1542_p12  ;;  %p1563_p8 = por %p1562_p4, %p1561_p1 }
  0x2d   : > { %p1557_p6 = pneg %p1556_p9 }
  0x2f   : > { %p1564_p2 = pnand %p1563_p8, %p1557_p6 }
  0x31   : > { %1567 = shalt.err (!%p1564_p2)
}
  0x32   : > { %s1703_s27 = smov 192   ;;  %s1704_s8 = smov 12  }
  0x33   : > { %1391 = dma.hbm_to_vmem [thread:$0]  (!%p1814_p10), %s2289_s3, 3072, %s198_s9, [#allocation6], %s1703_s27, %s1703_s27, %s1704_s8  }
  0x34   : > { %s31_s13 = sadd.s32 1, %s1692_s23  ;;  %s34_s14 = sadd.s32 1, %s1696_s24 }
  0x35   : > { %p32_p1 = scmp.ge.s32.totalorder %s31_s13, 2  ;;  %s43_s15 = sadd.s32 1, %s1680_s20 }
  0x36   : > { %p50_p2 = scmp.ne.s32.totalorder %s1680_s20, %s1676_s19  ;;  %p51_p4 = scmp.eq.s32.totalorder %s1700_s25, 0 }
  0x37   : > { %s2312_s13 = smov (%p32_p1, %s31_s13), 0  ;;  %s2314_s14 = smov (!%p32_p1, %s34_s14), %s1696_s24 }
  0x38   : > { %2290 = sst [smem:[#allocation14_spill]] %s2312_s13  ;;  %s39_s16 = ssub.s32 %s1692_s23, %s2312_s13 }
  0x39   : > { %p36_p6 = scmp.ge.s32.totalorder %s2314_s14, 2  ;;  %p2291_p8 = scmp.ne.s32.totalorder %s2283_s29, 0 }
  0x3a   : > { %p1851_p10 = por %p51_p4, %p50_p2  ;;  %p1401_p12 = scmp.lt.s32.totalorder %s1700_s25, 4 }
  0x3b   : > { %p1847_p11 = por %p2291_p8, %p50_p2  ;;  %s2316_s14 = smov (%p36_p6, %s2314_s14), 0 }
  0x3c   : > { %2294 = sst [smem:[#allocation15_spill]] %s2316_s14  ;;  %s214_s17 = sand.u32 1, %s1680_s20  }
  0x3d   : > { %s1228_s26 = sshll.u32 %s1692_s23, 4  ;;  %s38_s27 = ssub.s32 %s1696_s24, %s2316_s14 }
  0x3e   : > { %s40_s8 = sor.u32 %s39_s16, %s38_s27  ;;  %s1227_s11 = sshll.u32 %s214_s17, 7 }
  0x3f   : > { %p41_p13 = scmp.eq.s32.totalorder %s40_s8, 0  ;;  %s1229_s29 = sshll.u32 %s1696_s24, 5 }
  0x40   : > { %s218_s12 = scalar_lea.vmem [#allocation2], %s1227_s11  ;;  %s224_s6 = sadd.s32 %s1229_s29, %s1228_s26 }
  0x41   : > { %s227_s3 = sshll.u32 %s218_s12, 4  ;;  %s1230_s18 = sshll.u32 %s224_s6, 7  ;;  %s1866_s3 = int_to_ptr.vmem [resolvable:$true] %s227_s3 }
  0x42   : > { %s1864_s13 = scalar_select %p41_p13, %s1680_s20, %s43_s15  }
  0x43   : > { %p1872_p0 = pnand %p1401_p12, %p1851_p10  ;;  %s1879_s16 = scalar_lea.hbm %s2262_s0, %s1230_s18 }
  0x44   : > { %s1881_s15 = scalar_lea.sflag [#allocation3], %s214_s17  ;;  %s1568_s6 = scalar_lea.hbm %s1879_s16, 2048 }
  0x45   : > { %p1569_p3 = scmp.ne.s32.totalorder %s1879_s16, %s1568_s6  ;;  %p1570_p5 = pneg %p1872_p0 }
  0x46   : > { %s1573_s14 = scalar_lea.hbm %s2262_s0, 8192  ;;  %p1574_p1 = scmp.lt.u32.totalorder %s1879_s16, %s2262_s0 }
  0x47   : > { %p1571_p7 = pnand %p1570_p5, %p1569_p3  ;;  %p1575_p2 = scmp.lt.u32.totalorder %s1573_s14, %s1568_s6 }
  0x48   : > { %p1577_p6 = scmp.lt.u32.totalorder %s1568_s6, %s1879_s16 }
  0x49   : > { %p1572_p9 = pneg %p1571_p7  ;;  %p1576_p4 = por %p1575_p2, %p1574_p1 }
  0x4b   : > { %p1578_p8 = por %p1577_p6, %p1576_p4 }
  0x4d   : > { %p1579_p10 = pnand %p1578_p8, %p1572_p9 }
  0x4f   : > { %1582 = shalt.err (!%p1579_p10)
}
  0x50   : > { %s1583_s17 = scalar_lea.vmem %s1866_s3, 2048  ;;  %s1705_s27 = smov [#allocation2]  }
  0x51   : > { %p1584_p12 = scmp.ne.s32.totalorder %s1866_s3, %s1583_s17  ;;  %s1588_s8 = sshll.u32 %s1705_s27, 4  ;;  %s1589_s8 = int_to_ptr.vmem [resolvable:$false] %s1588_s8 }
  0x52   : > { %s1590_s11 = scalar_lea.vmem %s1589_s8, 4096  ;;  %p1591_p7 = scmp.lt.s32.totalorder %s1866_s3, %s1589_s8 }
  0x53   : > { %p1586_p13 = pnand %p1584_p12, %p1570_p5  ;;  %p1592_p1 = scmp.lt.s32.totalorder %s1590_s11, %s1583_s17 }
  0x55   : > { %p1587_p3 = pneg %p1586_p13  ;;  %p1593_p2 = por %p1592_p1, %p1591_p7 }
  0x57   : > { %p1594_p4 = pnand %p1593_p2, %p1587_p3 }
  0x59   : > { %1597 = shalt.err (!%p1594_p4)
}
  0x5a   : > { %s1706_s29 = smov 128   ;;  %s1707_s12 = smov 8  }
  0x5b   : > { %1395 = dma.hbm_to_vmem [thread:$0]  (!%p1872_p0), %s1879_s16, 2048, %s1866_s3, %s1881_s15, %s1706_s29, %s1706_s29, %s1707_s12  }
  0x5c   : > { %p2296_p5 = scmp.ne.s32.totalorder %s2287_s7, 0 }
  0x5d   : > { %s1912_s6 = sand.u32 (!%p2296_p5), 1, %s1676_s19   ;;  %p2297_p9 = scmp.ne.s32.totalorder (!%p2296_p5), %s2284_s30, 0 }
  0x5e   : > { %239 = sbr.rel (%p2296_p5) target bundleno = 713 (0x2c9), region = 40  ;;  %s1232_s9 = sshll.u32 (!%p2296_p5), %s1912_s6, 7 }
  0x5f   : > { %s242_s23 = scalar_lea.sflag (!%p2296_p5), [#allocation3], %s1912_s6  ;;  %s1916_s14 = scalar_lea.vmem (!%p2296_p5), [#allocation2], %s1232_s9 }
  0x65   : > { %1659 = dma.done.wait (%p2297_p9), %s242_s23, 2048  }
  0x66   : > { %1661 = vsyncadd (%p2297_p9), %s242_s23, 4294965248  ;;  %p2298_p0 = scmp.ne.s32.totalorder %s2282_s28, 0 }
  0x68   : > { %1663 = dma.done.wait (%p2298_p0), [#allocation6], 3072  }
  0x69   : > { %1665 = vsyncadd (%p2298_p0), [#allocation6], 4294964224  ;;  %v279_v0 = vld [vmem:[%s1916_s14] sm:$0xff]  ;;  %v281_v1 = vld [vmem:[%s1916_s14 + $0x10] sm:$0xff]  ;;  %s1377_s15 = smul.u32 192, %s1912_s6  ;;  %s2299_s29 = sld [smem:[#allocation17_spill]] }
  0x6a   : > { %297 = vadd.xlane.f32.xlu0 %v279_v0  ;;  %301 = vadd.xlane.f32.xlu1 %v281_v1  ;;  %v280_v2 = vld [vmem:[%s1916_s14 + $0x8] sm:$0xff]  ;;  %v282_v3 = vld [vmem:[%s1916_s14 + $0x18] sm:$0xff]  ;;  %v283_v4 = vld [vmem:[%s1916_s14 + $0x20] sm:$0xff]  ;;  %s1378_s26 = smul.u32 48, %s1684_s21  ;;  %s1106_s9 = scalar_lea.sflag [#allocation4], %s1912_s6 }
  0x6b   : > { %v284_v5 = vld [vmem:[%s1916_s14 + $0x28] sm:$0xff]  ;;  %v285_v6 = vld [vmem:[%s1916_s14 + $0x30] sm:$0xff]  ;;  %v1934_v7 = vld [vmem:[%s1916_s14 + $0x38] sm:$0xff]  ;;  %s2123_s18 = scalar_lea.vmem [#allocation7], %s1377_s15  ;;  %s1379_s17 = smul.u32 96, %s1688_s22 }
  0x6c   : > { %v1937_v8 = vld [vmem:[%s1916_s14 + $0x40] sm:$0xff]  ;;  %v1940_v9 = vld [vmem:[%s1916_s14 + $0x48] sm:$0xff]  ;;  %v1946_v10 = vld [vmem:[%s1916_s14 + $0x50] sm:$0xff]  ;;  %s1122_s21 = sshll.u32 %s2123_s18, 4  ;;  %s2201_s21 = int_to_ptr.vmem [resolvable:$true] %s1122_s21 }
  0x6d   : > { %v1949_v11 = vld [vmem:[%s1916_s14 + $0x58] sm:$0xff]  ;;  %v1954_v12 = vld [vmem:[%s1916_s14 + $0x60] sm:$0xff]  ;;  %v1957_v13 = vld [vmem:[%s1916_s14 + $0x68] sm:$0xff]  ;;  %s1119_s27 = sadd.s32 %s1379_s17, %s1378_s26  ;;  %s1598_s23 = scalar_lea.vmem %s2201_s21, 3072 }
  0x6e   : > { %299 = vadd.xlane.f32.xlu0 %v280_v2  ;;  %303 = vadd.xlane.f32.xlu1 %v282_v3  ;;  %v1962_v14 = vld [vmem:[%s1916_s14 + $0x70] sm:$0xff]  ;;  %v1965_v15 = vld [vmem:[%s1916_s14 + $0x78] sm:$0xff]  ;;  %v1478_v17 = vld [vmem:[#allocation5] ss:$12 sps:$4 sm:$0xff]   ;;  %s1294_s22 = sshll.u32 %s1119_s27, 6  ;;  %p1599_p6 = scmp.ne.s32.totalorder %s2201_s21, %s1598_s23 }
  0x6f   : > { %v1476_v16 = vld [vmem:[#allocation5 + $0x4] ss:$12 sps:$4 sm:$0xff]   ;;  %v1479_v18 = vld [vmem:[#allocation5 + $0x1c] ss:$12 sps:$4 sm:$0xff]   ;;  %s2207_s12 = scalar_lea.hbm %s2299_s29, %s1294_s22  ;;  %s1709_s14 = smov [#allocation7]  }
  0x70   : > { %v1481_v19 = vld [vmem:[#allocation5 + $0x8] ss:$12 sps:$4 sm:$0xff]   ;;  %703 = vmatprep.subr.bf16.mxu0 %v1476_v16  ;;  %v1482_v58 = vld [vmem:[#allocation5 + $0x18] ss:$12 sps:$4 sm:$0xff]   ;;  %p1600_p8 = pnand %p1599_p6, %p1847_p11  ;;  %s1602_s3 = sshll.u32 %s1709_s14, 4  ;;  %s1603_s3 = int_to_ptr.vmem [resolvable:$false] %s1602_s3 }
  0x71   : > { %704 = vmatpush1.bf16.msra.mxu0 %v1478_v17  ;;  %1345 = vmatprep.subr.bf16.mxu1 %v1481_v19  ;;  %s1604_s5 = scalar_lea.vmem %s1603_s3, 6144  ;;  %p1605_p12 = scmp.lt.s32.totalorder %s2201_s21, %s1603_s3 }
  0x72   : > { %305 = vadd.xlane.f32.xlu0 %v283_v4  ;;  %307 = vadd.xlane.f32.xlu1 %v284_v5  ;;  %p1601_p10 = pneg %p1600_p8  ;;  %p1606_p13 = scmp.lt.s32.totalorder %s1604_s5, %s1598_s23 }
  0x73   : > { %705 = vmatprep.subr.bf16.mxu0 %v1479_v18  ;;  %1346 = vmatpush3.bf16.msra.mxu1 %v1481_v19  ;;  %v1487_v18 = vld [vmem:[#allocation5 + $0x4c] ss:$12 sps:$4 sm:$0xff]  }
  0x74   : > { %v1489_v19 = vld [vmem:[#allocation5 + $0x38] ss:$12 sps:$4 sm:$0xff]   ;;  %p1607_p3 = por %p1606_p13, %p1605_p12 }
  0x75   : > { %706 = vmatpush1.bf16.msra.mxu0 %v1482_v58 }
  0x76   : > { %309 = vadd.xlane.f32.xlu0 %v285_v6  ;;  %311 = vadd.xlane.f32.xlu1 %v1934_v7  ;;  %p1608_p7 = pnand %p1607_p3, %p1601_p10 }
  0x7a   : > { %313 = vadd.xlane.f32.xlu0 %v1937_v8  ;;  %315 = vadd.xlane.f32.xlu1 %v1940_v9 }
  0x7e   : > { %317 = vadd.xlane.f32.xlu0 %v1946_v10  ;;  %319 = vadd.xlane.f32.xlu1 %v1949_v11 }
  0x82   : > { %321 = vadd.xlane.f32.xlu0 %v1954_v12  ;;  %323 = vadd.xlane.f32.xlu1 %v1957_v13 }
  0x86   : > { %325 = vadd.xlane.f32.xlu0 %v1962_v14  ;;  %327 = vadd.xlane.f32.xlu1 %v1965_v15 }
  0xf7   : > { %v298_v20 = vpop.xlane.xlu0 %297  ;;  %v302_v21 = vpop.xlane.xlu1 %301 }
  0xf8   : > { %v330_v22 = vmul.f32 0.0078125, %v298_v20  ;;  %v332_v23 = vmul.f32 0.0078125, %v302_v21 }
  0xfa   : > { %v1969_v24 = vsub.f32 %v279_v0, %v330_v22  ;;  %v1971_v25 = vsub.f32 %v281_v1, %v332_v23  ;;  %v1483_v0 = vld [vmem:[#allocation5 + $0x34] ss:$12 sps:$4 sm:$0xff]  }
  0xfb   : > { %v300_v26 = vpop.xlane.xlu0 %299  ;;  %v304_v27 = vpop.xlane.xlu1 %303  ;;  %v1485_v1 = vld [vmem:[#allocation5 + $0x20] ss:$12 sps:$4 sm:$0xff]   ;;  %707 = vmatprep.subr.bf16.mxu0 %v1483_v0  ;;  %v1490_v22 = vld [vmem:[#allocation5 + $0x48] ss:$12 sps:$4 sm:$0xff]  }
  0xfc   : > { %v331_v28 = vmul.f32 0.0078125, %v300_v26  ;;  %v362_v29 = vmul.f32 %v1969_v24, %v1969_v24  ;;  %v333_v30 = vmul.f32 0.0078125, %v304_v27  ;;  %v364_v33 = vmul.f32 %v1971_v25, %v1971_v25  ;;  %1347 = vmatprep.subr.bf16.mxu1 %v1485_v1 }
  0xfd   : > { %1348 = vmatpush3.bf16.msra.mxu1 %v1485_v1 }
  0xfe   : > { %v1975_v31 = vsub.f32 %v280_v2, %v331_v28  ;;  %378 = vadd.xlane.f32.xlu0 %v362_v29  ;;  %v1977_v32 = vsub.f32 %v282_v3, %v333_v30  ;;  %1349 = vmatprep.subr.bf16.mxu1 %v1489_v19  ;;  %v1491_v29 = vld [vmem:[#allocation5 + $0x64] ss:$12 sps:$4 sm:$0xff]  }
  0xff   : > { %v306_v34 = vpop.xlane.xlu0 %305  ;;  %v308_v35 = vpop.xlane.xlu1 %307  ;;  %v1493_v30 = vld [vmem:[#allocation5 + $0x50] ss:$12 sps:$4 sm:$0xff]  }
 0x100   : > { %v334_v36 = vmul.f32 0.0078125, %v306_v34  ;;  %v363_v37 = vmul.f32 %v1975_v31, %v1975_v31  ;;  %v335_v38 = vmul.f32 0.0078125, %v308_v35  ;;  %v365_v41 = vmul.f32 %v1977_v32, %v1977_v32  ;;  %v1497_v35 = vld [vmem:[#allocation5 + $0x68] ss:$12 sps:$4 sm:$0xff]  }
 0x101   : > { %1350 = vmatpush3.bf16.msra.mxu1 %v1489_v19 }
 0x102   : > { %v1983_v39 = vsub.f32 %v283_v4, %v334_v36  ;;  %382 = vadd.xlane.f32.xlu0 %v364_v33  ;;  %380 = vadd.xlane.f32.xlu1 %v363_v37  ;;  %v1985_v40 = vsub.f32 %v284_v5, %v335_v38  ;;  %v1494_v33 = vld [vmem:[#allocation5 + $0x60] ss:$12 sps:$4 sm:$0xff]   ;;  %v1498_v36 = vld [vmem:[#allocation5 + $0x78] ss:$12 sps:$4 sm:$0xff]  }
 0x103   : > { %v310_v42 = vpop.xlane.xlu0 %309  ;;  %v312_v43 = vpop.xlane.xlu1 %311  ;;  %1351 = vmatprep.subr.bf16.mxu1 %v1493_v30  ;;  %v1499_v37 = vld [vmem:[#allocation5 + $0x94] ss:$12 sps:$4 sm:$0xff]  }
 0x104   : > { %v336_v44 = vmul.f32 0.0078125, %v310_v42  ;;  %v366_v45 = vmul.f32 %v1983_v39, %v1983_v39  ;;  %v337_v46 = vmul.f32 0.0078125, %v312_v43  ;;  %v367_v49 = vmul.f32 %v1985_v40, %v1985_v40  ;;  %v1501_v38 = vld [vmem:[#allocation5 + $0x80] ss:$12 sps:$4 sm:$0xff]   ;;  %v1505_v43 = vld [vmem:[#allocation5 + $0x98] ss:$12 sps:$4 sm:$0xff]  }
 0x105   : > { %1352 = vmatpush3.bf16.msra.mxu1 %v1493_v30  ;;  %v1503_v42 = vld [vmem:[#allocation5 + $0xac] ss:$12 sps:$4 sm:$0xff]  }
 0x106   : > { %v1991_v47 = vsub.f32 %v285_v6, %v336_v44  ;;  %384 = vadd.xlane.f32.xlu1 %v365_v41  ;;  %386 = vadd.xlane.f32.xlu0 %v366_v45  ;;  %v1994_v48 = vsub.f32 %v1934_v7, %v337_v46  ;;  %v1486_v7 = vld [vmem:[#allocation5 + $0x30] ss:$12 sps:$4 sm:$0xff]   ;;  %v1506_v44 = vld [vmem:[#allocation5 + $0xa8] ss:$12 sps:$4 sm:$0xff]   ;;  %v1708_v46 = vmov 0  }
 0x107   : > { %v314_v50 = vpop.xlane.xlu0 %313  ;;  %v316_v51 = vpop.xlane.xlu1 %315  ;;  %708 = vmatpush1.bf16.msra.mxu0 %v1486_v7  ;;  %1353 = vmatprep.subr.bf16.mxu1 %v1497_v35  ;;  %v1502_v41 = vld [vmem:[#allocation5 + $0x90] ss:$12 sps:$4 sm:$0xff]  }
 0x108   : > { %v338_v52 = vmul.f32 0.0078125, %v314_v50  ;;  %v368_v53 = vmul.f32 %v1991_v47, %v1991_v47  ;;  %v339_v54 = vmul.f32 0.0078125, %v316_v51  ;;  %v369_v57 = vmul.f32 %v1994_v48, %v1994_v48  ;;  %709 = vmatprep.subr.bf16.mxu0 %v1487_v18  ;;  %v1507_v45 = vld [vmem:[#allocation5 + $0xb0] ss:$12 sps:$4 sm:$0xff]   ;;  %735 = vmatprep.mubr.bf16.mxu0 %v1708_v46 }
 0x109   : > { %1354 = vmatpush3.bf16.msra.mxu1 %v1497_v35 }
 0x10a   : > { %v2001_v55 = vsub.f32 %v1937_v8, %v338_v52  ;;  %388 = vadd.xlane.f32.xlu1 %v367_v49  ;;  %390 = vadd.xlane.f32.xlu0 %v368_v53  ;;  %v2004_v56 = vsub.f32 %v1940_v9, %v339_v54 }
 0x10b   : > { %v318_v59 = vpop.xlane.xlu0 %317  ;;  %v320_v60 = vpop.xlane.xlu1 %319  ;;  %710 = vmatpush1.bf16.msra.mxu0 %v1490_v22  ;;  %1355 = vmatprep.subr.bf16.mxu1 %v1501_v38  ;;  %v2047_v22 = vld [vmem:[%s2263_s1] ss:$0 sm:$0xff] }
 0x10c   : > { %v340_v61 = vmul.f32 0.0078125, %v318_v59  ;;  %v370_v62 = vmul.f32 %v2001_v55, %v2001_v55  ;;  %v341_v63 = vmul.f32 0.0078125, %v320_v60  ;;  %v371_v4 = vmul.f32 %v2004_v56, %v2004_v56  ;;  %711 = vmatprep.subr.bf16.mxu0 %v1491_v29 }
 0x10d   : > { %1356 = vmatpush3.bf16.msra.mxu1 %v1501_v38 }
 0x10e   : > { %v2011_v2 = vsub.f32 %v1946_v10, %v340_v61  ;;  %392 = vadd.xlane.f32.xlu1 %v369_v57  ;;  %394 = vadd.xlane.f32.xlu0 %v370_v62  ;;  %v2014_v3 = vsub.f32 %v1949_v11, %v341_v63 }
 0x10f   : > { %v322_v5 = vpop.xlane.xlu0 %321  ;;  %v324_v6 = vpop.xlane.xlu1 %323  ;;  %712 = vmatpush1.bf16.msra.mxu0 %v1494_v33  ;;  %1357 = vmatprep.subr.bf16.mxu1 %v1505_v43 }
 0x110   : > { %v342_v8 = vmul.f32 0.0078125, %v322_v5  ;;  %v372_v9 = vmul.f32 %v2011_v2, %v2011_v2  ;;  %v343_v16 = vmul.f32 0.0078125, %v324_v6  ;;  %v373_v17 = vmul.f32 %v2014_v3, %v2014_v3 }
 0x111   : > { %1358 = vmatpush3.bf16.msra.mxu1 %v1505_v43 }
 0x112   : > { %v2021_v10 = vsub.f32 %v1954_v12, %v342_v8  ;;  %396 = vadd.xlane.f32.xlu1 %v371_v4  ;;  %398 = vadd.xlane.f32.xlu0 %v372_v9  ;;  %v2024_v11 = vsub.f32 %v1957_v13, %v343_v16 }
 0x113   : > { %v326_v20 = vpop.xlane.xlu0 %325  ;;  %v328_v21 = vpop.xlane.xlu1 %327  ;;  %1359 = vmatprep.subr.bf16.mxu1 %v1507_v45 }
 0x114   : > { %v344_v23 = vmul.f32 0.0078125, %v326_v20  ;;  %v374_v26 = vmul.f32 %v2021_v10, %v2021_v10  ;;  %v345_v27 = vmul.f32 0.0078125, %v328_v21  ;;  %v375_v28 = vmul.f32 %v2024_v11, %v2024_v11 }
 0x115   : > { %1360 = vmatpush3.bf16.msra.mxu1 %v1507_v45 }
 0x116   : > { %v2031_v12 = vsub.f32 %v1962_v14, %v344_v23  ;;  %400 = vadd.xlane.f32.xlu1 %v373_v17  ;;  %402 = vadd.xlane.f32.xlu0 %v374_v26  ;;  %v2034_v13 = vsub.f32 %v1965_v15, %v345_v27  ;;  %v1495_v15 = vld [vmem:[#allocation5 + $0x7c] ss:$12 sps:$4 sm:$0xff]  }
 0x117   : > { %713 = vmatprep.subr.bf16.mxu0 %v1495_v15  ;;  %v2054_v15 = vld [vmem:[%s2264_s2] ss:$0 sm:$0xff] }
 0x118   : > { %v376_v34 = vmul.f32 %v2031_v12, %v2031_v12  ;;  %v377_v14 = vmul.f32 %v2034_v13, %v2034_v13  ;;  %714 = vmatpush1.bf16.msra.mxu0 %v1498_v36 }
 0x119   : > { %715 = vmatprep.subr.bf16.mxu0 %v1499_v37 }
 0x11a   : > { %404 = vadd.xlane.f32.xlu1 %v375_v28  ;;  %406 = vadd.xlane.f32.xlu0 %v376_v34 }
 0x11c   : > { %716 = vmatpush1.bf16.msra.mxu0 %v1502_v41 }
 0x11d   : > { %717 = vmatprep.subr.bf16.mxu0 %v1503_v42 }
 0x11e   : > { %408 = vadd.xlane.f32.xlu1 %v377_v14 }
 0x120   : > { %718 = vmatpush1.bf16.msra.mxu0 %v1506_v44 }
 0x18b   : > { %v379_v49 = vpop.xlane.xlu0 %378 }
 0x18c   : > { %v410_v50 = vmul.f32 0.0078125, %v379_v49 }
 0x18e   : > { %v426_v51 = vadd.f32 1e-05, %v410_v50 }
 0x18f   : > { %v381_v52 = vpop.xlane.xlu1 %380  ;;  %v383_v53 = vpop.xlane.xlu0 %382 }
 0x190   : > { %1508 = vrsqrt.f32 %v426_v51  ;;  %v411_v54 = vmul.f32 0.0078125, %v381_v52  ;;  %v412_v57 = vmul.f32 0.0078125, %v383_v53 }
 0x192   : > { %v427_v58 = vadd.f32 1e-05, %v411_v54  ;;  %v428_v59 = vadd.f32 1e-05, %v412_v57 }
 0x193   : > { %v385_v60 = vpop.xlane.xlu1 %384  ;;  %v387_v61 = vpop.xlane.xlu0 %386 }
 0x194   : > { %1510 = vrsqrt.f32 %v427_v58  ;;  %v413_v62 = vmul.f32 0.0078125, %v385_v60  ;;  %v414_v63 = vmul.f32 0.0078125, %v387_v61 }
 0x195   : > { %1512 = vrsqrt.f32 %v428_v59 }
 0x196   : > { %v429_v0 = vadd.f32 1e-05, %v413_v62  ;;  %v430_v1 = vadd.f32 1e-05, %v414_v63 }
 0x197   : > { %v389_v4 = vpop.xlane.xlu1 %388  ;;  %v391_v5 = vpop.xlane.xlu0 %390 }
 0x198   : > { %1514 = vrsqrt.f32 %v429_v0  ;;  %v415_v6 = vmul.f32 0.0078125, %v389_v4  ;;  %v416_v7 = vmul.f32 0.0078125, %v391_v5 }
 0x199   : > { %1516 = vrsqrt.f32 %v430_v1 }
 0x19a   : > { %v1509_v8 = vpop.eup %1508  ;;  %v431_v9 = vadd.f32 1e-05, %v415_v6  ;;  %v432_v16 = vadd.f32 1e-05, %v416_v7 }
 0x19b   : > { %v393_v17 = vpop.xlane.xlu1 %392  ;;  %v395_v18 = vpop.xlane.xlu0 %394  ;;  %v458_v19 = vmul.f32 %v1509_v8, %v1969_v24 }
 0x19c   : > { %1518 = vrsqrt.f32 %v431_v9  ;;  %v417_v20 = vmul.f32 0.0078125, %v393_v17  ;;  %v418_v21 = vmul.f32 0.0078125, %v395_v18 }
 0x19d   : > { %1520 = vrsqrt.f32 %v432_v16  ;;  %v480_v34 = vmul.f32 %v2047_v22, %v458_v19 }
 0x19e   : > { %v1511_v23 = vpop.eup %1510  ;;  %v433_v26 = vadd.f32 1e-05, %v417_v20  ;;  %v434_v27 = vadd.f32 1e-05, %v418_v21 }
 0x19f   : > { %v1513_v28 = vpop.eup %1512  ;;  %v397_v29 = vpop.xlane.xlu1 %396  ;;  %v459_v33 = vmul.f32 %v1511_v23, %v1975_v31  ;;  %v502_v45 = vadd.f32 %v2054_v15, %v480_v34 }
 0x1a0   : > { %v399_v30 = vpop.xlane.xlu0 %398  ;;  %1522 = vrsqrt.f32 %v433_v26  ;;  %v419_v24 = vmul.f32 0.0078125, %v397_v29  ;;  %v460_v35 = vmul.f32 %v1513_v28, %v1971_v25 }
 0x1a1   : > { %v420_v14 = vmul.f32 0.0078125, %v399_v30  ;;  %1524 = vrsqrt.f32 %v434_v27  ;;  %v481_v36 = vmul.f32 %v2047_v22, %v459_v33 }
 0x1a2   : > { %v1515_v37 = vpop.eup %1514  ;;  %v435_v38 = vadd.f32 1e-05, %v419_v24  ;;  %v482_v31 = vmul.f32 %v2047_v22, %v460_v35 }
 0x1a3   : > { %v436_v41 = vadd.f32 1e-05, %v420_v14  ;;  %v1517_v42 = vpop.eup %1516  ;;  %v401_v43 = vpop.xlane.xlu1 %400  ;;  %v503_v49 = vadd.f32 %v2054_v15, %v481_v36  ;;  %v461_v50 = vmul.f32 %v1515_v37, %v1977_v32 }
 0x1a4   : > { %v403_v44 = vpop.xlane.xlu0 %402  ;;  %1526 = vrsqrt.f32 %v435_v38  ;;  %v421_v51 = vmul.f32 0.0078125, %v401_v43  ;;  %v462_v54 = vmul.f32 %v1517_v42, %v1983_v39  ;;  %v504_v60 = vadd.f32 %v2054_v15, %v482_v31 }
 0x1a5   : > { %v422_v25 = vmul.f32 0.0078125, %v403_v44  ;;  %1528 = vrsqrt.f32 %v436_v41  ;;  %v518_v52 = vpack.c.bf16 %v503_v49, %v502_v45  ;;  %v483_v53 = vmul.f32 %v2047_v22, %v461_v50 }
 0x1a6   : > { %v1519_v57 = vpop.eup %1518  ;;  %v437_v58 = vadd.f32 1e-05, %v421_v51  ;;  %v484_v1 = vmul.f32 %v2047_v22, %v462_v54 }
 0x1a7   : > { %v438_v59 = vadd.f32 1e-05, %v422_v25  ;;  %v1521_v61 = vpop.eup %1520  ;;  %v405_v62 = vpop.xlane.xlu1 %404  ;;  %736 = vmatmul.mubr.bf16.vlgmr.msra.gmra.mrb[0].mxu0 %v518_v52  ;;  %1361 = vmatprep.mubr.bf16.mxu1 %v518_v52  ;;  %v505_v32 = vadd.f32 %v2054_v15, %v483_v53  ;;  %v463_v0 = vmul.f32 %v1519_v57, %v1985_v40 }
 0x1a8   : > { %v407_v63 = vpop.xlane.xlu0 %406  ;;  %1530 = vrsqrt.f32 %v437_v58  ;;  %v423_v4 = vmul.f32 0.0078125, %v405_v62  ;;  %745 = vmatprep.mubr.bf16.mxu0 %v1708_v46  ;;  %v464_v39 = vmul.f32 %v1521_v61, %v1991_v47  ;;  %v506_v19 = vadd.f32 %v2054_v15, %v484_v1 }
 0x1a9   : > { %v424_v5 = vmul.f32 0.0078125, %v407_v63  ;;  %1532 = vrsqrt.f32 %v438_v59  ;;  %v519_v6 = vpack.c.bf16 %v505_v32, %v504_v60  ;;  %v485_v7 = vmul.f32 %v2047_v22, %v463_v0 }
 0x1aa   : > { %v1523_v8 = vpop.eup %1522  ;;  %v439_v9 = vadd.f32 1e-05, %v423_v4  ;;  %v486_v17 = vmul.f32 %v2047_v22, %v464_v39 }
 0x1ab   : > { %v440_v16 = vadd.f32 1e-05, %v424_v5  ;;  %v1525_v18 = vpop.eup %1524  ;;  %v409_v40 = vpop.xlane.xlu1 %408  ;;  %1362 = vmatmul.mubr.bf16.vlgmr.msra.gmra.mrb[0].mxu1 %v519_v6  ;;  %v507_v20 = vadd.f32 %v2054_v15, %v485_v7  ;;  %v465_v21 = vmul.f32 %v1523_v8, %v1994_v48 }
 0x1ac   : > { %1534 = vrsqrt.f32 %v439_v9  ;;  %v425_v47 = vmul.f32 0.0078125, %v409_v40  ;;  %v466_v23 = vmul.f32 %v1525_v18, %v2001_v55  ;;  %v508_v30 = vadd.f32 %v2054_v15, %v486_v17 }
 0x1ad   : > { %1536 = vrsqrt.f32 %v440_v16  ;;  %v520_v26 = vpack.c.bf16 %v507_v20, %v506_v19  ;;  %v487_v27 = vmul.f32 %v2047_v22, %v465_v21 }
 0x1ae   : > { %v1527_v28 = vpop.eup %1526  ;;  %v441_v29 = vadd.f32 1e-05, %v425_v47  ;;  %v488_v48 = vmul.f32 %v2047_v22, %v466_v23 }
 0x1af   : > { %v1529_v33 = vpop.eup %1528  ;;  %746 = vmatmul.mubr.bf16.gmra.mrb[4].mxu0 %v519_v6  ;;  %1365 = vmatprep.mubr.bf16.mxu1 %v520_v26  ;;  %v509_v34 = vadd.f32 %v2054_v15, %v487_v27  ;;  %v467_v24 = vmul.f32 %v1527_v28, %v2004_v56 }
 0x1b0   : > { %1538 = vrsqrt.f32 %v441_v29  ;;  %755 = vmatprep.mubr.bf16.mxu0 %v1708_v46  ;;  %v468_v55 = vmul.f32 %v1529_v33, %v2011_v2  ;;  %v510_v41 = vadd.f32 %v2054_v15, %v488_v48 }
 0x1b1   : > { %v521_v14 = vpack.c.bf16 %v509_v34, %v508_v30  ;;  %v489_v35 = vmul.f32 %v2047_v22, %v467_v24 }
 0x1b2   : > { %v1531_v36 = vpop.eup %1530  ;;  %v490_v37 = vmul.f32 %v2047_v22, %v468_v55 }
 0x1b3   : > { %v1533_v38 = vpop.eup %1532  ;;  %1366 = vmatmul.mubr.bf16.gmra.mrb[4].mxu1 %v521_v14  ;;  %v511_v31 = vadd.f32 %v2054_v15, %v489_v35  ;;  %v469_v56 = vmul.f32 %v1531_v36, %v2014_v3 }
 0x1b4   : > { %v470_v42 = vmul.f32 %v1533_v38, %v2021_v10  ;;  %v512_v45 = vadd.f32 %v2054_v15, %v490_v37 }
 0x1b5   : > { %v522_v43 = vpack.c.bf16 %v511_v31, %v510_v41  ;;  %v491_v44 = vmul.f32 %v2047_v22, %v469_v56 }
 0x1b6   : > { %v1535_v2 = vpop.eup %1534  ;;  %v492_v25 = vmul.f32 %v2047_v22, %v470_v42 }
 0x1b7   : > { %v1537_v49 = vpop.eup %1536  ;;  %756 = vmatmul.mubr.bf16.gmra.mrb[8].mxu0 %v520_v26  ;;  %1369 = vmatprep.mubr.bf16.mxu1 %v522_v43  ;;  %v513_v50 = vadd.f32 %v2054_v15, %v491_v44  ;;  %v471_v51 = vmul.f32 %v1535_v2, %v2024_v11 }
 0x1b8   : > { %765 = vmatprep.mubr.bf16.mxu0 %v1708_v46  ;;  %v472_v3 = vmul.f32 %v1537_v49, %v2031_v12  ;;  %v514_v54 = vadd.f32 %v2054_v15, %v492_v25 }
 0x1b9   : > { %v523_v10 = vpack.c.bf16 %v513_v50, %v512_v45  ;;  %v493_v52 = vmul.f32 %v2047_v22, %v471_v51 }
 0x1ba   : > { %v1539_v53 = vpop.eup %1538  ;;  %v494_v59 = vmul.f32 %v2047_v22, %v472_v3 }
 0x1bb   : > { %1370 = vmatmul.mubr.bf16.gmra.mrb[8].mxu1 %v523_v10  ;;  %v515_v57 = vadd.f32 %v2054_v15, %v493_v52  ;;  %v473_v58 = vmul.f32 %v1539_v53, %v2034_v13  ;;  %v560_v13 = vlaneseq }
 0x1bc   : > { %v516_v12 = vadd.f32 %v2054_v15, %v494_v59 }
 0x1bd   : > { %v524_v11 = vpack.c.bf16 %v515_v57, %v514_v54  ;;  %v495_v60 = vmul.f32 %v2047_v22, %v473_v58  ;;  %v561_v22 = vshrl.u32 %v560_v13, 7 }
 0x1bf   : > { %766 = vmatmul.mubr.bf16.gmra.mrb[12].mxu0 %v521_v14  ;;  %1373 = vmatprep.mubr.bf16.mxu1 %v524_v11  ;;  %v517_v61 = vadd.f32 %v2054_v15, %v495_v60  ;;  %v562_v63 = vsub.s32 0, %v561_v22  ;;  %v558_v15 = vld [vmem:[%s2266_s4] sm:$0x7]  ;;  %v566_v32 = vsub.s32 1, %v561_v22  ;;  %v570_v1 = vsub.s32 2, %v561_v22 }
 0x1c0   : > { %775 = vmatprep.mubr.bf16.mxu0 %v1708_v46 }
 0x1c1   : > { %v525_v62 = vpack.c.bf16 %v517_v61, %v516_v12  ;;  %v2111_v0 = vrot.slane %v558_v15, %v562_v63  ;;  %v2113_v4 = vrot.slane %v558_v15, %v566_v32 }
 0x1c3   : > { %1374 = vmatmul.mubr.bf16.gmra.mrb[12].mxu1 %v525_v62 }
 0x1c7   : > { %776 = vmatmul.mubr.bf16.gmra.mrb[16].mxu0 %v522_v43 }
 0x1c8   : > { %785 = vmatprep.mubr.bf16.mxu0 %v1708_v46 }
 0x1cf   : > { %786 = vmatmul.mubr.bf16.gmra.mrb[20].mxu0 %v523_v10 }
 0x1d0   : > { %795 = vmatprep.mubr.bf16.mxu0 %v1708_v46 }
 0x1d7   : > { %796 = vmatmul.mubr.bf16.gmra.mrb[24].mxu0 %v524_v11 }
 0x1d8   : > { %805 = vmatprep.mubr.bf16.mxu0 %v1708_v46  ;;  %v2117_v46 = vrot.slane %v558_v15, %v570_v1 }
 0x1df   : > { %806 = vmatmul.mubr.bf16.gmra.mrb[28].mxu0 %v525_v62 }
 0x27a   : > { %v737_v5 = vpop.f32.mrb[0].mxu0 }
 0x27b   : > { %v738_v39 = vadd.f32 %v737_v5, %v2111_v0  ;;  %v739_v6 = vpop.f32.mrb[1].mxu0 }
 0x27c   : > { %v740_v7 = vadd.f32 %v739_v6, %v2113_v4  ;;  %v741_v8 = vpop.f32.mrb[2].mxu0 }
 0x27d   : > { %v742_v9 = vadd.f32 %v741_v8, %v2111_v0  ;;  %v743_v16 = vpop.f32.mrb[3].mxu0 }
 0x27e   : > { %v1297_v17 = vpack.c.bf16 %v740_v7, %v738_v39  ;;  %v744_v18 = vadd.f32 %v743_v16, %v2113_v4  ;;  %v1363_v40 = vpop.f32.mrb[0].mxu1 }
 0x27f   : > { %v859_v19 = vadd.f32 %v1363_v40, %v2117_v46  ;;  %v850_v20 = vpop.f32.mrb[1].mxu1 }
 0x280   : > { %1073 = vst [vmem:[%s2123_s18] sm:$0xff] %v1297_v17  ;;  %v1299_v21 = vpack.c.bf16 %v744_v18, %v742_v9  ;;  %v851_v47 = vadd.f32 %v850_v20, %v2117_v46  ;;  %v1364_v23 = vpop.f32.mrb[2].mxu1 }
 0x281   : > { %v1302_v26 = vpack.c.bf16 %v859_v19, %v859_v19  ;;  %v862_v27 = vadd.f32 %v1364_v23, %v2117_v46  ;;  %v853_v28 = vpop.f32.mrb[3].mxu1 }
 0x282   : > { %1075 = vst [vmem:[%s2123_s18 + $0xc] sm:$0xff] %v1299_v21  ;;  %v1298_v29 = vpack.c.bf16 %v851_v47, %v851_v47  ;;  %v854_v30 = vadd.f32 %v853_v28, %v2117_v46  ;;  %v747_v33 = vpop.f32.mrb[4].mxu0 }
 0x283   : > { %1078 = vst [vmem:[%s2123_s18 + $0x20] sm:$0xf] %v1302_v26  ;;  %v1304_v34 = vpack.c.bf16 %v862_v27, %v862_v27  ;;  %v748_v24 = vadd.f32 %v747_v33, %v2111_v0  ;;  %v749_v48 = vpop.f32.mrb[5].mxu0 }
 0x284   : > { %1074 = vst [vmem:[%s2123_s18 + $0x8] sm:$0xf] %v1298_v29  ;;  %v1300_v55 = vpack.c.bf16 %v854_v30, %v854_v30  ;;  %v750_v14 = vadd.f32 %v749_v48, %v2113_v4  ;;  %v751_v35 = vpop.f32.mrb[6].mxu0 }
 0x285   : > { %1080 = vst [vmem:[%s2123_s18 + $0x2c] sm:$0xf] %v1304_v34  ;;  %v752_v36 = vadd.f32 %v751_v35, %v2111_v0  ;;  %v753_v37 = vpop.f32.mrb[7].mxu0 }
 0x286   : > { %1076 = vst [vmem:[%s2123_s18 + $0x14] sm:$0xf] %v1300_v55  ;;  %v1301_v38 = vpack.c.bf16 %v750_v14, %v748_v24  ;;  %v754_v41 = vadd.f32 %v753_v37, %v2113_v4  ;;  %v1367_v31 = vpop.f32.mrb[4].mxu1 }
 0x287   : > { %v875_v56 = vadd.f32 %v1367_v31, %v2117_v46  ;;  %v866_v42 = vpop.f32.mrb[5].mxu1 }
 0x288   : > { %1077 = vst [vmem:[%s2123_s18 + $0x18] sm:$0xff] %v1301_v38  ;;  %v1303_v43 = vpack.c.bf16 %v754_v41, %v752_v36  ;;  %v867_v44 = vadd.f32 %v866_v42, %v2117_v46  ;;  %v1368_v2 = vpop.f32.mrb[6].mxu1 }
 0x289   : > { %v1310_v45 = vpack.c.bf16 %v875_v56, %v875_v56  ;;  %v878_v49 = vadd.f32 %v1368_v2, %v2117_v46  ;;  %v869_v50 = vpop.f32.mrb[7].mxu1 }
 0x28a   : > { %1079 = vst [vmem:[%s2123_s18 + $0x24] sm:$0xff] %v1303_v43  ;;  %v1306_v51 = vpack.c.bf16 %v867_v44, %v867_v44  ;;  %v870_v25 = vadd.f32 %v869_v50, %v2117_v46  ;;  %v757_v3 = vpop.f32.mrb[8].mxu0 }
 0x28b   : > { %1086 = vst [vmem:[%s2123_s18 + $0x50] sm:$0xf] %v1310_v45  ;;  %v1312_v10 = vpack.c.bf16 %v878_v49, %v878_v49  ;;  %v758_v52 = vadd.f32 %v757_v3, %v2111_v0  ;;  %v759_v53 = vpop.f32.mrb[9].mxu0 }
 0x28c   : > { %1082 = vst [vmem:[%s2123_s18 + $0x38] sm:$0xf] %v1306_v51  ;;  %v1308_v54 = vpack.c.bf16 %v870_v25, %v870_v25  ;;  %v760_v57 = vadd.f32 %v759_v53, %v2113_v4  ;;  %v761_v58 = vpop.f32.mrb[10].mxu0 }
 0x28d   : > { %1088 = vst [vmem:[%s2123_s18 + $0x5c] sm:$0xf] %v1312_v10  ;;  %v762_v59 = vadd.f32 %v761_v58, %v2111_v0  ;;  %v763_v11 = vpop.f32.mrb[11].mxu0 }
 0x28e   : > { %1084 = vst [vmem:[%s2123_s18 + $0x44] sm:$0xf] %v1308_v54  ;;  %v1305_v60 = vpack.c.bf16 %v760_v57, %v758_v52  ;;  %v764_v12 = vadd.f32 %v763_v11, %v2113_v4  ;;  %v1371_v61 = vpop.f32.mrb[8].mxu1 }
 0x28f   : > { %v891_v62 = vadd.f32 %v1371_v61, %v2117_v46  ;;  %v882_v13 = vpop.f32.mrb[9].mxu1 }
 0x290   : > { %1081 = vst [vmem:[%s2123_s18 + $0x30] sm:$0xff] %v1305_v60  ;;  %v1307_v22 = vpack.c.bf16 %v764_v12, %v762_v59  ;;  %v883_v63 = vadd.f32 %v882_v13, %v2117_v46  ;;  %v1372_v15 = vpop.f32.mrb[10].mxu1 }
 0x291   : > { %v1318_v32 = vpack.c.bf16 %v891_v62, %v891_v62  ;;  %v894_v1 = vadd.f32 %v1372_v15, %v2117_v46  ;;  %v885_v5 = vpop.f32.mrb[11].mxu1 }
 0x292   : > { %1083 = vst [vmem:[%s2123_s18 + $0x3c] sm:$0xff] %v1307_v22  ;;  %v1314_v39 = vpack.c.bf16 %v883_v63, %v883_v63  ;;  %v886_v6 = vadd.f32 %v885_v5, %v2117_v46  ;;  %v767_v7 = vpop.f32.mrb[12].mxu0 }
 0x293   : > { %1094 = vst [vmem:[%s2123_s18 + $0x80] sm:$0xf] %v1318_v32  ;;  %v1320_v8 = vpack.c.bf16 %v894_v1, %v894_v1  ;;  %v768_v9 = vadd.f32 %v767_v7, %v2111_v0  ;;  %v769_v16 = vpop.f32.mrb[13].mxu0 }
 0x294   : > { %1090 = vst [vmem:[%s2123_s18 + $0x68] sm:$0xf] %v1314_v39  ;;  %v1316_v17 = vpack.c.bf16 %v886_v6, %v886_v6  ;;  %v770_v18 = vadd.f32 %v769_v16, %v2113_v4  ;;  %v771_v40 = vpop.f32.mrb[14].mxu0 }
 0x295   : > { %1096 = vst [vmem:[%s2123_s18 + $0x8c] sm:$0xf] %v1320_v8  ;;  %v772_v19 = vadd.f32 %v771_v40, %v2111_v0  ;;  %v773_v20 = vpop.f32.mrb[15].mxu0 }
 0x296   : > { %1092 = vst [vmem:[%s2123_s18 + $0x74] sm:$0xf] %v1316_v17  ;;  %v1309_v21 = vpack.c.bf16 %v770_v18, %v768_v9  ;;  %v774_v47 = vadd.f32 %v773_v20, %v2113_v4  ;;  %v1375_v23 = vpop.f32.mrb[12].mxu1 }
 0x297   : > { %v907_v26 = vadd.f32 %v1375_v23, %v2117_v46  ;;  %v898_v27 = vpop.f32.mrb[13].mxu1 }
 0x298   : > { %1085 = vst [vmem:[%s2123_s18 + $0x48] sm:$0xff] %v1309_v21  ;;  %v1311_v28 = vpack.c.bf16 %v774_v47, %v772_v19  ;;  %v899_v29 = vadd.f32 %v898_v27, %v2117_v46  ;;  %v1376_v30 = vpop.f32.mrb[14].mxu1 }
 0x299   : > { %v1326_v33 = vpack.c.bf16 %v907_v26, %v907_v26  ;;  %v910_v34 = vadd.f32 %v1376_v30, %v2117_v46  ;;  %v901_v24 = vpop.f32.mrb[15].mxu1 }
 0x29a   : > { %1087 = vst [vmem:[%s2123_s18 + $0x54] sm:$0xff] %v1311_v28  ;;  %v1322_v48 = vpack.c.bf16 %v899_v29, %v899_v29  ;;  %v902_v55 = vadd.f32 %v901_v24, %v2117_v46  ;;  %v777_v14 = vpop.f32.mrb[16].mxu0 }
 0x29b   : > { %1102 = vst [vmem:[%s2123_s18 + $0xb0] sm:$0xf] %v1326_v33  ;;  %v1328_v35 = vpack.c.bf16 %v910_v34, %v910_v34  ;;  %v778_v36 = vadd.f32 %v777_v14, %v2111_v0  ;;  %v779_v37 = vpop.f32.mrb[17].mxu0 }
 0x29c   : > { %1098 = vst [vmem:[%s2123_s18 + $0x98] sm:$0xf] %v1322_v48  ;;  %v1324_v38 = vpack.c.bf16 %v902_v55, %v902_v55  ;;  %v780_v41 = vadd.f32 %v779_v37, %v2113_v4  ;;  %v781_v31 = vpop.f32.mrb[18].mxu0 }
 0x29d   : > { %1104 = vst [vmem:[%s2123_s18 + $0xbc] sm:$0xf] %v1328_v35  ;;  %v782_v56 = vadd.f32 %v781_v31, %v2111_v0  ;;  %v783_v42 = vpop.f32.mrb[19].mxu0 }
 0x29e   : > { %1100 = vst [vmem:[%s2123_s18 + $0xa4] sm:$0xf] %v1324_v38  ;;  %v1313_v46 = vpack.c.bf16 %v780_v41, %v778_v36  ;;  %v784_v43 = vadd.f32 %v783_v42, %v2113_v4 }
 0x2a0   : > { %1089 = vst [vmem:[%s2123_s18 + $0x60] sm:$0xff] %v1313_v46  ;;  %v1315_v44 = vpack.c.bf16 %v784_v43, %v782_v56 }
 0x2a2   : > { %1091 = vst [vmem:[%s2123_s18 + $0x6c] sm:$0xff] %v1315_v44  ;;  %v787_v2 = vpop.f32.mrb[20].mxu0 }
 0x2a3   : > { %v788_v45 = vadd.f32 %v787_v2, %v2111_v0  ;;  %v789_v49 = vpop.f32.mrb[21].mxu0 }
 0x2a4   : > { %v790_v50 = vadd.f32 %v789_v49, %v2113_v4  ;;  %v791_v51 = vpop.f32.mrb[22].mxu0 }
 0x2a5   : > { %v792_v25 = vadd.f32 %v791_v51, %v2111_v0  ;;  %v793_v3 = vpop.f32.mrb[23].mxu0 }
 0x2a6   : > { %v1317_v10 = vpack.c.bf16 %v790_v50, %v788_v45  ;;  %v794_v52 = vadd.f32 %v793_v3, %v2113_v4 }
 0x2a8   : > { %1093 = vst [vmem:[%s2123_s18 + $0x78] sm:$0xff] %v1317_v10  ;;  %v1319_v53 = vpack.c.bf16 %v794_v52, %v792_v25 }
 0x2aa   : > { %1095 = vst [vmem:[%s2123_s18 + $0x84] sm:$0xff] %v1319_v53  ;;  %v797_v54 = vpop.f32.mrb[24].mxu0 }
 0x2ab   : > { %v798_v57 = vadd.f32 %v797_v54, %v2111_v0  ;;  %v799_v58 = vpop.f32.mrb[25].mxu0 }
 0x2ac   : > { %v800_v59 = vadd.f32 %v799_v58, %v2113_v4  ;;  %v801_v11 = vpop.f32.mrb[26].mxu0 }
 0x2ad   : > { %v802_v60 = vadd.f32 %v801_v11, %v2111_v0  ;;  %v803_v12 = vpop.f32.mrb[27].mxu0 }
 0x2ae   : > { %v1321_v61 = vpack.c.bf16 %v800_v59, %v798_v57  ;;  %v804_v62 = vadd.f32 %v803_v12, %v2113_v4 }
 0x2b0   : > { %1097 = vst [vmem:[%s2123_s18 + $0x90] sm:$0xff] %v1321_v61  ;;  %v1323_v13 = vpack.c.bf16 %v804_v62, %v802_v60 }
 0x2b2   : > { %1099 = vst [vmem:[%s2123_s18 + $0x9c] sm:$0xff] %v1323_v13  ;;  %v807_v22 = vpop.f32.mrb[28].mxu0 }
 0x2b3   : > { %v808_v63 = vadd.f32 %v807_v22, %v2111_v0  ;;  %v809_v15 = vpop.f32.mrb[29].mxu0 }
 0x2b4   : > { %v810_v32 = vadd.f32 %v809_v15, %v2113_v4  ;;  %v811_v1 = vpop.f32.mrb[30].mxu0 }
 0x2b5   : > { %v812_v5 = vadd.f32 %v811_v1, %v2111_v0  ;;  %v813_v39 = vpop.f32.mrb[31].mxu0 }
 0x2b6   : > { %v1325_v6 = vpack.c.bf16 %v810_v32, %v808_v63  ;;  %v814_v7 = vadd.f32 %v813_v39, %v2113_v4 }
 0x2b8   : > { %1101 = vst [vmem:[%s2123_s18 + $0xa8] sm:$0xff] %v1325_v6  ;;  %v1327_v8 = vpack.c.bf16 %v814_v7, %v812_v5 }
 0x2ba   : > { %1103 = vst [vmem:[%s2123_s18 + $0xb4] sm:$0xff] %v1327_v8 }
 0x2bb   : > { %1611 = shalt.err (!%p1608_p7)
}
 0x2bc   : > { %s1612_s28 = scalar_lea.hbm %s2207_s12, 3072  ;;  %s1616_s16 = scalar_lea.hbm %s2299_s29, 12288 }
 0x2bd   : > { %p1613_p1 = scmp.ne.s32.totalorder %s2207_s12, %s1612_s28  ;;  %p1617_p5 = scmp.lt.u32.totalorder %s2207_s12, %s2299_s29 }
 0x2be   : > { %p1618_p9 = scmp.lt.u32.totalorder %s1616_s16, %s1612_s28  ;;  %p1620_p6 = scmp.lt.u32.totalorder %s1612_s28, %s2207_s12 }
 0x2bf   : > { %p1614_p2 = pnand %p1613_p1, %p1847_p11 }
 0x2c0   : > { %p1619_p0 = por %p1618_p9, %p1617_p5 }
 0x2c1   : > { %p1615_p4 = pneg %p1614_p2 }
 0x2c2   : > { %p1621_p8 = por %p1620_p6, %p1619_p0 }
 0x2c4   : > { %p1622_p10 = pnand %p1621_p8, %p1615_p4 }
 0x2c6   : > { %1625 = shalt.err (!%p1622_p10)
}
 0x2c7   : > { %s1710_s26 = smov 192   ;;  %s1711_s17 = smov 12  }
 0x2c8   : > { %1386 = dma.vmem_to_hbm [thread:$0]  (%p1847_p11), %s2201_s21, 3072, %s2207_s12, %s1106_s9, %s1710_s26, %s1710_s26, %s1711_s17  }
 0x2c9 PF: > { %s2300_s27 = sld [smem:[#allocation11_spill]]  ;;  %s2301_s22 = sld [smem:[#allocation13_spill]] }
 0x2ca   : > { %p1403_p12 = scmp.ge.s32.totalorder %s1700_s25, 2 }
 0x2cf   : > { %s1137_s8 = sand.u32 1, %s2300_s27   ;;  %p2302_p13 = scmp.ne.s32.totalorder %s2301_s22, 0 }
 0x2d0   : > { %s1138_s11 = scalar_lea.sflag [#allocation4], %s1137_s8 }
 0x2d1   : > { %p1397_p3 = pnand %p1403_p12, %p2302_p13 }
 0x2d3   : > { %1667 = dma.done.wait (!%p1397_p3), %s1138_s11, 3072  }
 0x2d4   : > { %1669 = vsyncadd (!%p1397_p3), %s1138_s11, 4294964224  ;;  %s22_s25 = sadd.s32 1, %s1700_s25   ;;  %s2303_s21 = sld [smem:[#allocation12_spill]] }
 0x2d5   : > { %p19_p7 = scmp.ge.s32.totalorder %s22_s25, 6   ;;  %s2304_s23 = sld [smem:[#allocation14_spill]] }
 0x2d6   : > { %s2305_s10 = sld [smem:[#allocation15_spill]]  ;;  %s2306_s18 = smov %s1676_s19 }
 0x2d7   : > { %s2307_s19 = smov %s1680_s20  ;;  %s2308_s20 = smov %s1864_s13 }
 0x2d8   : > { %s2309_s22 = smov %s1696_s24  ;;  %21 = sbr.rel (!%p19_p7) target bundleno = 11 (0xb), region = 89 }
 0x2dc   : > { %s2310_s24 = smov %s2305_s10 }
 0x2df   :  { %1143 = vsyncpa [#allocation3], 1 }
 0x2e0   :  { %1145 = vsyncpa [#allocation3 + $0x1], 1 }
 0x2e1   :  { %1146 = vsyncpa [#allocation6], 1 }
 0x2e2   :  { %1147 = vsyncpa [#allocation4], 1 }
 0x2e3   :  { %1149 = vsyncpa [#allocation4 + $0x1], 1 }

// kernel: tpu_custom_call.1
= control target key start
LH: loop header
LB: loop body
LE: loop exit
PB: predicated region body
PF: predicated region fallthrough
CT: control target
= control target key end

     0   :  { %s2262_s0 = inlined_call_operand.hbm [shape: f32[2,256,128], index: 0, kind: input, shape index: {}]   ;;  %s2263_s1 = inlined_call_operand.vmem [shape: f32[1,128], index: 1, kind: input, shape index: {}]   ;;  %s2264_s2 = inlined_call_operand.vmem [shape: f32[1,128], index: 2, kind: input, shape index: {}]   ;;  %s2265_s3 = inlined_call_operand.hbm [shape: bf16[128,384], index: 3, kind: input, shape index: {}]   ;;  %s2266_s4 = inlined_call_operand.vmem [shape: f32[1,384], index: 4, kind: input, shape index: {}]   ;;  %s2267_s5 = inlined_call_operand.hbm [shape: bf16[2,256,384], index: 5, kind: output, shape index: {}]  }
   0x1   :  { %2278 = sst [smem:[#allocation16_spill]] %s2265_s3 }
   0x2   :  { %2279 = sst [smem:[#allocation17_spill]] %s2267_s5 }
   0x3   :  { %10 = vsyncpa [#allocation3], 0 }
   0x4   :  { %12 = vsyncpa [#allocation3 + $0x1], 0 }
   0x5   :  { %13 = vsyncpa [#allocation6], 0 }
   0x6   :  { %14 = vsyncpa [#allocation4], 0 }
   0x7   :  { %16 = vsyncpa [#allocation4 + $0x1], 0  ;;  %s1742_s18 = smov 0   ;;  %s1744_s19 = smov 0  }
   0x8   :  { %s1746_s20 = smov 0   ;;  %s1748_s21 = smov 0  }
   0x9   :  { %s1750_s22 = smov 0   ;;  %s1752_s23 = smov 0  }
   0xa   :  { %s1754_s24 = smov 0   ;;  %s1756_s25 = smov 0  }
   0xb LB: > { %2280 = sst [smem:[#allocation11_spill]] %s1672_s18  ;;  %s1222_s26 = sadd.s32 4294967295, %s1700_s25   ;;  %s1700_s25 = sphi %s1756_s25, %s22_s25   ;;  %s1696_s24 = sphi %s1754_s24, %s2310_s24   ;;  %s1692_s23 = sphi %s1752_s23, %s2304_s23   ;;  %s1688_s22 = sphi %s1750_s22, %s2309_s22   ;;  %s1684_s21 = sphi %s1748_s21, %s2303_s21   ;;  %s1680_s20 = sphi %s1746_s20, %s2308_s20   ;;  %s1676_s19 = sphi %s1744_s19, %s2307_s19   ;;  %s1672_s18 = sphi %s1742_s18, %s2306_s18  }
   0xc   : > { %2281 = sst [smem:[#allocation12_spill]] %s1692_s23  ;;  %s1223_s27 = sadd.s32 4294967294, %s1700_s25  }
   0xd   : > { %p56_p0 = scmp.ne.s32.totalorder %s1676_s19, %s1672_s18  ;;  %p1786_p1 = scmp.eq.s32.totalorder %s1222_s26, 0 }
   0xe   : > { %p1790_p2 = scmp.eq.s32.totalorder %s1222_s26, 3  ;;  %p172_p3 = scmp.eq.s32.totalorder %s1223_s27, 3 }
   0xf   : > { %s2282_s28 = scalar_select %p1786_p1, 1, 0 }
  0x10   : > { %s2283_s29 = scalar_select %p1790_p2, 1, 0 }
  0x11   : > { %p1796_p4 = por %p1786_p1, %p56_p0  ;;  %p1224_p5 = scmp.ge.s32.totalorder %s1700_s25, 1 }
  0x12   : > { %p1801_p6 = por %p172_p3, %p56_p0  ;;  %p179_p7 = scmp.lt.s32.totalorder %s1700_s25, 5 }
  0x13   : > { %s2284_s30 = scalar_select %p1796_p4, 1, 0 }
  0x14   : > { %s2285_s6 = scalar_select %p1801_p6, 1, 0 }
  0x15   : > { %p1806_p8 = pnand %p1224_p5, %p179_p7  ;;  %s1702_s8 = smov [#allocation5]  }
  0x16   : > { %2286 = sst [smem:[#allocation13_spill]] %s2285_s6  ;;  %s197_s9 = sshll.u32 %s1702_s8, 4  ;;  %s198_s9 = int_to_ptr.vmem [resolvable:$true] %s197_s9 }
  0x17   : > { %s2287_s7 = scalar_select %p1806_p8, 1, 0 }
  0x18   : > { %p1388_p9 = pneg %p1806_p8  ;;  %s2289_s3 = sld [smem:[#allocation16_spill]] }
  0x1a   : > { %p1814_p10 = pnand %p1388_p9, %p1786_p1 }
  0x1c   : > { %p1542_p12 = pneg %p1814_p10 }
  0x1e   : > { %s1540_s13 = scalar_lea.hbm %s2289_s3, 3072 }
  0x1f   : > { %p1541_p11 = scmp.ne.s32.totalorder %s2289_s3, %s1540_s13  ;;  %p1547_p3 = scmp.lt.u32.totalorder %s1540_s13, %s2289_s3 }
  0x21   : > { %p1543_p13 = pnand %p1542_p12, %p1541_p11 }
  0x23   : > { %p1544_p0 = pneg %p1543_p13 }
  0x25   : > { %p1549_p5 = pnand %p1547_p3, %p1544_p0 }
  0x27   : > { %1552 = shalt.err (!%p1549_p5)
}
  0x28   : > { %s1553_s26 = scalar_lea.vmem %s198_s9, 3072  ;;  %p1561_p1 = scmp.lt.s32.totalorder %s198_s9, %s198_s9 }
  0x29   : > { %p1554_p7 = scmp.ne.s32.totalorder %s198_s9, %s1553_s26  ;;  %p1562_p4 = scmp.lt.s32.totalorder %s1553_s26, %s1553_s26 }
  0x2b   : > { %p1556_p9 = pnand %p1554_p7, %p1542_p12  ;;  %p1563_p8 = por %p1562_p4, %p1561_p1 }
  0x2d   : > { %p1557_p6 = pneg %p1556_p9 }
  0x2f   : > { %p1564_p2 = pnand %p1563_p8, %p1557_p6 }
  0x31   : > { %1567 = shalt.err (!%p1564_p2)
}
  0x32   : > { %s1703_s27 = smov 192   ;;  %s1704_s8 = smov 12  }
  0x33   : > { %1391 = dma.hbm_to_vmem [thread:$0]  (!%p1814_p10), %s2289_s3, 3072, %s198_s9, [#allocation6], %s1703_s27, %s1703_s27, %s1704_s8  }
  0x34   : > { %s31_s13 = sadd.s32 1, %s1692_s23  ;;  %s34_s14 = sadd.s32 1, %s1696_s24 }
  0x35   : > { %p32_p1 = scmp.ge.s32.totalorder %s31_s13, 2  ;;  %s43_s15 = sadd.s32 1, %s1680_s20 }
  0x36   : > { %p50_p2 = scmp.ne.s32.totalorder %s1680_s20, %s1676_s19  ;;  %p51_p4 = scmp.eq.s32.totalorder %s1700_s25, 0 }
  0x37   : > { %s2312_s13 = smov (%p32_p1, %s31_s13), 0  ;;  %s2314_s14 = smov (!%p32_p1, %s34_s14), %s1696_s24 }
  0x38   : > { %2290 = sst [smem:[#allocation14_spill]] %s2312_s13  ;;  %s39_s16 = ssub.s32 %s1692_s23, %s2312_s13 }
  0x39   : > { %p36_p6 = scmp.ge.s32.totalorder %s2314_s14, 2  ;;  %p2291_p8 = scmp.ne.s32.totalorder %s2283_s29, 0 }
  0x3a   : > { %p1851_p10 = por %p51_p4, %p50_p2  ;;  %p1401_p12 = scmp.lt.s32.totalorder %s1700_s25, 4 }
  0x3b   : > { %p1847_p11 = por %p2291_p8, %p50_p2  ;;  %s2316_s14 = smov (%p36_p6, %s2314_s14), 0 }
  0x3c   : > { %2294 = sst [smem:[#allocation15_spill]] %s2316_s14  ;;  %s214_s17 = sand.u32 1, %s1680_s20  }
  0x3d   : > { %s1228_s26 = sshll.u32 %s1692_s23, 4  ;;  %s38_s27 = ssub.s32 %s1696_s24, %s2316_s14 }
  0x3e   : > { %s40_s8 = sor.u32 %s39_s16, %s38_s27  ;;  %s1227_s11 = sshll.u32 %s214_s17, 7 }
  0x3f   : > { %p41_p13 = scmp.eq.s32.totalorder %s40_s8, 0  ;;  %s1229_s29 = sshll.u32 %s1696_s24, 5 }
  0x40   : > { %s218_s12 = scalar_lea.vmem [#allocation2], %s1227_s11  ;;  %s224_s6 = sadd.s32 %s1229_s29, %s1228_s26 }
  0x41   : > { %s227_s3 = sshll.u32 %s218_s12, 4  ;;  %s1230_s18 = sshll.u32 %s224_s6, 7  ;;  %s1866_s3 = int_to_ptr.vmem [resolvable:$true] %s227_s3 }
  0x42   : > { %s1864_s13 = scalar_select %p41_p13, %s1680_s20, %s43_s15  }
  0x43   : > { %p1872_p0 = pnand %p1401_p12, %p1851_p10  ;;  %s1879_s16 = scalar_lea.hbm %s2262_s0, %s1230_s18 }
  0x44   : > { %s1881_s15 = scalar_lea.sflag [#allocation3], %s214_s17  ;;  %s1568_s6 = scalar_lea.hbm %s1879_s16, 2048 }
  0x45   : > { %p1569_p3 = scmp.ne.s32.totalorder %s1879_s16, %s1568_s6  ;;  %p1570_p5 = pneg %p1872_p0 }
  0x46   : > { %s1573_s14 = scalar_lea.hbm %s2262_s0, 8192  ;;  %p1574_p1 = scmp.lt.u32.totalorder %s1879_s16, %s2262_s0 }
  0x47   : > { %p1571_p7 = pnand %p1570_p5, %p1569_p3  ;;  %p1575_p2 = scmp.lt.u32.totalorder %s1573_s14, %s1568_s6 }
  0x48   : > { %p1577_p6 = scmp.lt.u32.totalorder %s1568_s6, %s1879_s16 }
  0x49   : > { %p1572_p9 = pneg %p1571_p7  ;;  %p1576_p4 = por %p1575_p2, %p1574_p1 }
  0x4b   : > { %p1578_p8 = por %p1577_p6, %p1576_p4 }
  0x4d   : > { %p1579_p10 = pnand %p1578_p8, %p1572_p9 }
  0x4f   : > { %1582 = shalt.err (!%p1579_p10)
}
  0x50   : > { %s1583_s17 = scalar_lea.vmem %s1866_s3, 2048  ;;  %s1705_s27 = smov [#allocation2]  }
  0x51   : > { %p1584_p12 = scmp.ne.s32.totalorder %s1866_s3, %s1583_s17  ;;  %s1588_s8 = sshll.u32 %s1705_s27, 4  ;;  %s1589_s8 = int_to_ptr.vmem [resolvable:$false] %s1588_s8 }
  0x52   : > { %s1590_s11 = scalar_lea.vmem %s1589_s8, 4096  ;;  %p1591_p7 = scmp.lt.s32.totalorder %s1866_s3, %s1589_s8 }
  0x53   : > { %p1586_p13 = pnand %p1584_p12, %p1570_p5  ;;  %p1592_p1 = scmp.lt.s32.totalorder %s1590_s11, %s1583_s17 }
  0x55   : > { %p1587_p3 = pneg %p1586_p13  ;;  %p1593_p2 = por %p1592_p1, %p1591_p7 }
  0x57   : > { %p1594_p4 = pnand %p1593_p2, %p1587_p3 }
  0x59   : > { %1597 = shalt.err (!%p1594_p4)
}
  0x5a   : > { %s1706_s29 = smov 128   ;;  %s1707_s12 = smov 8  }
  0x5b   : > { %1395 = dma.hbm_to_vmem [thread:$0]  (!%p1872_p0), %s1879_s16, 2048, %s1866_s3, %s1881_s15, %s1706_s29, %s1706_s29, %s1707_s12  }
  0x5c   : > { %p2296_p5 = scmp.ne.s32.totalorder %s2287_s7, 0 }
  0x5d   : > { %s1912_s6 = sand.u32 (!%p2296_p5), 1, %s1676_s19   ;;  %p2297_p9 = scmp.ne.s32.totalorder (!%p2296_p5), %s2284_s30, 0 }
  0x5e   : > { %239 = sbr.rel (%p2296_p5) target bundleno = 713 (0x2c9), region = 40  ;;  %s1232_s9 = sshll.u32 (!%p2296_p5), %s1912_s6, 7 }
  0x5f   : > { %s242_s23 = scalar_lea.sflag (!%p2296_p5), [#allocation3], %s1912_s6  ;;  %s1916_s14 = scalar_lea.vmem (!%p2296_p5), [#allocation2], %s1232_s9 }
  0x65   : > { %1659 = dma.done.wait (%p2297_p9), %s242_s23, 2048  }
  0x66   : > { %1661 = vsyncadd (%p2297_p9), %s242_s23, 4294965248  ;;  %p2298_p0 = scmp.ne.s32.totalorder %s2282_s28, 0 }
  0x68   : > { %1663 = dma.done.wait (%p2298_p0), [#allocation6], 3072  }
  0x69   : > { %1665 = vsyncadd (%p2298_p0), [#allocation6], 4294964224  ;;  %v279_v0 = vld [vmem:[%s1916_s14] sm:$0xff]  ;;  %v281_v1 = vld [vmem:[%s1916_s14 + $0x10] sm:$0xff]  ;;  %s1377_s15 = smul.u32 192, %s1912_s6  ;;  %s2299_s29 = sld [smem:[#allocation17_spill]] }
  0x6a   : > { %297 = vadd.xlane.f32.xlu0 %v279_v0  ;;  %301 = vadd.xlane.f32.xlu1 %v281_v1  ;;  %v280_v2 = vld [vmem:[%s1916_s14 + $0x8] sm:$0xff]  ;;  %v282_v3 = vld [vmem:[%s1916_s14 + $0x18] sm:$0xff]  ;;  %v283_v4 = vld [vmem:[%s1916_s14 + $0x20] sm:$0xff]  ;;  %s1378_s26 = smul.u32 48, %s1684_s21  ;;  %s1106_s9 = scalar_lea.sflag [#allocation4], %s1912_s6 }
  0x6b   : > { %v284_v5 = vld [vmem:[%s1916_s14 + $0x28] sm:$0xff]  ;;  %v285_v6 = vld [vmem:[%s1916_s14 + $0x30] sm:$0xff]  ;;  %v1934_v7 = vld [vmem:[%s1916_s14 + $0x38] sm:$0xff]  ;;  %s2123_s18 = scalar_lea.vmem [#allocation7], %s1377_s15  ;;  %s1379_s17 = smul.u32 96, %s1688_s22 }
  0x6c   : > { %v1937_v8 = vld [vmem:[%s1916_s14 + $0x40] sm:$0xff]  ;;  %v1940_v9 = vld [vmem:[%s1916_s14 + $0x48] sm:$0xff]  ;;  %v1946_v10 = vld [vmem:[%s1916_s14 + $0x50] sm:$0xff]  ;;  %s1122_s21 = sshll.u32 %s2123_s18, 4  ;;  %s2201_s21 = int_to_ptr.vmem [resolvable:$true] %s1122_s21 }
  0x6d   : > { %v1949_v11 = vld [vmem:[%s1916_s14 + $0x58] sm:$0xff]  ;;  %v1954_v12 = vld [vmem:[%s1916_s14 + $0x60] sm:$0xff]  ;;  %v1957_v13 = vld [vmem:[%s1916_s14 + $0x68] sm:$0xff]  ;;  %s1119_s27 = sadd.s32 %s1379_s17, %s1378_s26  ;;  %s1598_s23 = scalar_lea.vmem %s2201_s21, 3072 }
  0x6e   : > { %299 = vadd.xlane.f32.xlu0 %v280_v2  ;;  %303 = vadd.xlane.f32.xlu1 %v282_v3  ;;  %v1962_v14 = vld [vmem:[%s1916_s14 + $0x70] sm:$0xff]  ;;  %v1965_v15 = vld [vmem:[%s1916_s14 + $0x78] sm:$0xff]  ;;  %v1478_v17 = vld [vmem:[#allocation5] ss:$12 sps:$4 sm:$0xff]   ;;  %s1294_s22 = sshll.u32 %s1119_s27, 6  ;;  %p1599_p6 = scmp.ne.s32.totalorder %s2201_s21, %s1598_s23 }
  0x6f   : > { %v1476_v16 = vld [vmem:[#allocation5 + $0x4] ss:$12 sps:$4 sm:$0xff]   ;;  %v1479_v18 = vld [vmem:[#allocation5 + $0x1c] ss:$12 sps:$4 sm:$0xff]   ;;  %s2207_s12 = scalar_lea.hbm %s2299_s29, %s1294_s22  ;;  %s1709_s14 = smov [#allocation7]  }
  0x70   : > { %v1481_v19 = vld [vmem:[#allocation5 + $0x8] ss:$12 sps:$4 sm:$0xff]   ;;  %703 = vmatprep.subr.bf16.mxu0 %v1476_v16  ;;  %v1482_v58 = vld [vmem:[#allocation5 + $0x18] ss:$12 sps:$4 sm:$0xff]   ;;  %p1600_p8 = pnand %p1599_p6, %p1847_p11  ;;  %s1602_s3 = sshll.u32 %s1709_s14, 4  ;;  %s1603_s3 = int_to_ptr.vmem [resolvable:$false] %s1602_s3 }
  0x71   : > { %704 = vmatpush1.bf16.msra.mxu0 %v1478_v17  ;;  %1345 = vmatprep.subr.bf16.mxu1 %v1481_v19  ;;  %s1604_s5 = scalar_lea.vmem %s1603_s3, 6144  ;;  %p1605_p12 = scmp.lt.s32.totalorder %s2201_s21, %s1603_s3 }
  0x72   : > { %305 = vadd.xlane.f32.xlu0 %v283_v4  ;;  %307 = vadd.xlane.f32.xlu1 %v284_v5  ;;  %p1601_p10 = pneg %p1600_p8  ;;  %p1606_p13 = scmp.lt.s32.totalorder %s1604_s5, %s1598_s23 }
  0x73   : > { %705 = vmatprep.subr.bf16.mxu0 %v1479_v18  ;;  %1346 = vmatpush3.bf16.msra.mxu1 %v1481_v19  ;;  %v1487_v18 = vld [vmem:[#allocation5 + $0x4c] ss:$12 sps:$4 sm:$0xff]  }
  0x74   : > { %v1489_v19 = vld [vmem:[#allocation5 + $0x38] ss:$12 sps:$4 sm:$0xff]   ;;  %p1607_p3 = por %p1606_p13, %p1605_p12 }
  0x75   : > { %706 = vmatpush1.bf16.msra.mxu0 %v1482_v58 }
  0x76   : > { %309 = vadd.xlane.f32.xlu0 %v285_v6  ;;  %311 = vadd.xlane.f32.xlu1 %v1934_v7  ;;  %p1608_p7 = pnand %p1607_p3, %p1601_p10 }
  0x7a   : > { %313 = vadd.xlane.f32.xlu0 %v1937_v8  ;;  %315 = vadd.xlane.f32.xlu1 %v1940_v9 }
  0x7e   : > { %317 = vadd.xlane.f32.xlu0 %v1946_v10  ;;  %319 = vadd.xlane.f32.xlu1 %v1949_v11 }
  0x82   : > { %321 = vadd.xlane.f32.xlu0 %v1954_v12  ;;  %323 = vadd.xlane.f32.xlu1 %v1957_v13 }
  0x86   : > { %325 = vadd.xlane.f32.xlu0 %v1962_v14  ;;  %327 = vadd.xlane.f32.xlu1 %v1965_v15 }
  0xf7   : > { %v298_v20 = vpop.xlane.xlu0 %297  ;;  %v302_v21 = vpop.xlane.xlu1 %301 }
  0xf8   : > { %v330_v22 = vmul.f32 0.0078125, %v298_v20  ;;  %v332_v23 = vmul.f32 0.0078125, %v302_v21 }
  0xfa   : > { %v1969_v24 = vsub.f32 %v279_v0, %v330_v22  ;;  %v1971_v25 = vsub.f32 %v281_v1, %v332_v23  ;;  %v1483_v0 = vld [vmem:[#allocation5 + $0x34] ss:$12 sps:$4 sm:$0xff]  }
  0xfb   : > { %v300_v26 = vpop.xlane.xlu0 %299  ;;  %v304_v27 = vpop.xlane.xlu1 %303  ;;  %v1485_v1 = vld [vmem:[#allocation5 + $0x20] ss:$12 sps:$4 sm:$0xff]   ;;  %707 = vmatprep.subr.bf16.mxu0 %v1483_v0  ;;  %v1490_v22 = vld [vmem:[#allocation5 + $0x48] ss:$12 sps:$4 sm:$0xff]  }
  0xfc   : > { %v331_v28 = vmul.f32 0.0078125, %v300_v26  ;;  %v362_v29 = vmul.f32 %v1969_v24, %v1969_v24  ;;  %v333_v30 = vmul.f32 0.0078125, %v304_v27  ;;  %v364_v33 = vmul.f32 %v1971_v25, %v1971_v25  ;;  %1347 = vmatprep.subr.bf16.mxu1 %v1485_v1 }
  0xfd   : > { %1348 = vmatpush3.bf16.msra.mxu1 %v1485_v1 }
  0xfe   : > { %v1975_v31 = vsub.f32 %v280_v2, %v331_v28  ;;  %378 = vadd.xlane.f32.xlu0 %v362_v29  ;;  %v1977_v32 = vsub.f32 %v282_v3, %v333_v30  ;;  %1349 = vmatprep.subr.bf16.mxu1 %v1489_v19  ;;  %v1491_v29 = vld [vmem:[#allocation5 + $0x64] ss:$12 sps:$4 sm:$0xff]  }
  0xff   : > { %v306_v34 = vpop.xlane.xlu0 %305  ;;  %v308_v35 = vpop.xlane.xlu1 %307  ;;  %v1493_v30 = vld [vmem:[#allocation5 + $0x50] ss:$12 sps:$4 sm:$0xff]  }
 0x100   : > { %v334_v36 = vmul.f32 0.0078125, %v306_v34  ;;  %v363_v37 = vmul.f32 %v1975_v31, %v1975_v31  ;;  %v335_v38 = vmul.f32 0.0078125, %v308_v35  ;;  %v365_v41 = vmul.f32 %v1977_v32, %v1977_v32  ;;  %v1497_v35 = vld [vmem:[#allocation5 + $0x68] ss:$12 sps:$4 sm:$0xff]  }
 0x101   : > { %1350 = vmatpush3.bf16.msra.mxu1 %v1489_v19 }
 0x102   : > { %v1983_v39 = vsub.f32 %v283_v4, %v334_v36  ;;  %382 = vadd.xlane.f32.xlu0 %v364_v33  ;;  %380 = vadd.xlane.f32.xlu1 %v363_v37  ;;  %v1985_v40 = vsub.f32 %v284_v5, %v335_v38  ;;  %v1494_v33 = vld [vmem:[#allocation5 + $0x60] ss:$12 sps:$4 sm:$0xff]   ;;  %v1498_v36 = vld [vmem:[#allocation5 + $0x78] ss:$12 sps:$4 sm:$0xff]  }
 0x103   : > { %v310_v42 = vpop.xlane.xlu0 %309  ;;  %v312_v43 = vpop.xlane.xlu1 %311  ;;  %1351 = vmatprep.subr.bf16.mxu1 %v1493_v30  ;;  %v1499_v37 = vld [vmem:[#allocation5 + $0x94] ss:$12 sps:$4 sm:$0xff]  }
 0x104   : > { %v336_v44 = vmul.f32 0.0078125, %v310_v42  ;;  %v366_v45 = vmul.f32 %v1983_v39, %v1983_v39  ;;  %v337_v46 = vmul.f32 0.0078125, %v312_v43  ;;  %v367_v49 = vmul.f32 %v1985_v40, %v1985_v40  ;;  %v1501_v38 = vld [vmem:[#allocation5 + $0x80] ss:$12 sps:$4 sm:$0xff]   ;;  %v1505_v43 = vld [vmem:[#allocation5 + $0x98] ss:$12 sps:$4 sm:$0xff]  }
 0x105   : > { %1352 = vmatpush3.bf16.msra.mxu1 %v1493_v30  ;;  %v1503_v42 = vld [vmem:[#allocation5 + $0xac] ss:$12 sps:$4 sm:$0xff]  }
 0x106   : > { %v1991_v47 = vsub.f32 %v285_v6, %v336_v44  ;;  %384 = vadd.xlane.f32.xlu1 %v365_v41  ;;  %386 = vadd.xlane.f32.xlu0 %v366_v45  ;;  %v1994_v48 = vsub.f32 %v1934_v7, %v337_v46  ;;  %v1486_v7 = vld [vmem:[#allocation5 + $0x30] ss:$12 sps:$4 sm:$0xff]   ;;  %v1506_v44 = vld [vmem:[#allocation5 + $0xa8] ss:$12 sps:$4 sm:$0xff]   ;;  %v1708_v46 = vmov 0  }
 0x107   : > { %v314_v50 = vpop.xlane.xlu0 %313  ;;  %v316_v51 = vpop.xlane.xlu1 %315  ;;  %708 = vmatpush1.bf16.msra.mxu0 %v1486_v7  ;;  %1353 = vmatprep.subr.bf16.mxu1 %v1497_v35  ;;  %v1502_v41 = vld [vmem:[#allocation5 + $0x90] ss:$12 sps:$4 sm:$0xff]  }
 0x108   : > { %v338_v52 = vmul.f32 0.0078125, %v314_v50  ;;  %v368_v53 = vmul.f32 %v1991_v47, %v1991_v47  ;;  %v339_v54 = vmul.f32 0.0078125, %v316_v51  ;;  %v369_v57 = vmul.f32 %v1994_v48, %v1994_v48  ;;  %709 = vmatprep.subr.bf16.mxu0 %v1487_v18  ;;  %v1507_v45 = vld [vmem:[#allocation5 + $0xb0] ss:$12 sps:$4 sm:$0xff]   ;;  %735 = vmatprep.mubr.bf16.mxu0 %v1708_v46 }
 0x109   : > { %1354 = vmatpush3.bf16.msra.mxu1 %v1497_v35 }
 0x10a   : > { %v2001_v55 = vsub.f32 %v1937_v8, %v338_v52  ;;  %388 = vadd.xlane.f32.xlu1 %v367_v49  ;;  %390 = vadd.xlane.f32.xlu0 %v368_v53  ;;  %v2004_v56 = vsub.f32 %v1940_v9, %v339_v54 }
 0x10b   : > { %v318_v59 = vpop.xlane.xlu0 %317  ;;  %v320_v60 = vpop.xlane.xlu1 %319  ;;  %710 = vmatpush1.bf16.msra.mxu0 %v1490_v22  ;;  %1355 = vmatprep.subr.bf16.mxu1 %v1501_v38  ;;  %v2047_v22 = vld [vmem:[%s2263_s1] ss:$0 sm:$0xff] }
 0x10c   : > { %v340_v61 = vmul.f32 0.0078125, %v318_v59  ;;  %v370_v62 = vmul.f32 %v2001_v55, %v2001_v55  ;;  %v341_v63 = vmul.f32 0.0078125, %v320_v60  ;;  %v371_v4 = vmul.f32 %v2004_v56, %v2004_v56  ;;  %711 = vmatprep.subr.bf16.mxu0 %v1491_v29 }
 0x10d   : > { %1356 = vmatpush3.bf16.msra.mxu1 %v1501_v38 }
 0x10e   : > { %v2011_v2 = vsub.f32 %v1946_v10, %v340_v61  ;;  %392 = vadd.xlane.f32.xlu1 %v369_v57  ;;  %394 = vadd.xlane.f32.xlu0 %v370_v62  ;;  %v2014_v3 = vsub.f32 %v1949_v11, %v341_v63 }
 0x10f   : > { %v322_v5 = vpop.xlane.xlu0 %321  ;;  %v324_v6 = vpop.xlane.xlu1 %323  ;;  %712 = vmatpush1.bf16.msra.mxu0 %v1494_v33  ;;  %1357 = vmatprep.subr.bf16.mxu1 %v1505_v43 }
 0x110   : > { %v342_v8 = vmul.f32 0.0078125, %v322_v5  ;;  %v372_v9 = vmul.f32 %v2011_v2, %v2011_v2  ;;  %v343_v16 = vmul.f32 0.0078125, %v324_v6  ;;  %v373_v17 = vmul.f32 %v2014_v3, %v2014_v3 }
 0x111   : > { %1358 = vmatpush3.bf16.msra.mxu1 %v1505_v43 }
 0x112   : > { %v2021_v10 = vsub.f32 %v1954_v12, %v342_v8  ;;  %396 = vadd.xlane.f32.xlu1 %v371_v4  ;;  %398 = vadd.xlane.f32.xlu0 %v372_v9  ;;  %v2024_v11 = vsub.f32 %v1957_v13, %v343_v16 }
 0x113   : > { %v326_v20 = vpop.xlane.xlu0 %325  ;;  %v328_v21 = vpop.xlane.xlu1 %327  ;;  %1359 = vmatprep.subr.bf16.mxu1 %v1507_v45 }
 0x114   : > { %v344_v23 = vmul.f32 0.0078125, %v326_v20  ;;  %v374_v26 = vmul.f32 %v2021_v10, %v2021_v10  ;;  %v345_v27 = vmul.f32 0.0078125, %v328_v21  ;;  %v375_v28 = vmul.f32 %v2024_v11, %v2024_v11 }
 0x115   : > { %1360 = vmatpush3.bf16.msra.mxu1 %v1507_v45 }
 0x116   : > { %v2031_v12 = vsub.f32 %v1962_v14, %v344_v23  ;;  %400 = vadd.xlane.f32.xlu1 %v373_v17  ;;  %402 = vadd.xlane.f32.xlu0 %v374_v26  ;;  %v2034_v13 = vsub.f32 %v1965_v15, %v345_v27  ;;  %v1495_v15 = vld [vmem:[#allocation5 + $0x7c] ss:$12 sps:$4 sm:$0xff]  }
 0x117   : > { %713 = vmatprep.subr.bf16.mxu0 %v1495_v15  ;;  %v2054_v15 = vld [vmem:[%s2264_s2] ss:$0 sm:$0xff] }
 0x118   : > { %v376_v34 = vmul.f32 %v2031_v12, %v2031_v12  ;;  %v377_v14 = vmul.f32 %v2034_v13, %v2034_v13  ;;  %714 = vmatpush1.bf16.msra.mxu0 %v1498_v36 }
 0x119   : > { %715 = vmatprep.subr.bf16.mxu0 %v1499_v37 }
 0x11a   : > { %404 = vadd.xlane.f32.xlu1 %v375_v28  ;;  %406 = vadd.xlane.f32.xlu0 %v376_v34 }
 0x11c   : > { %716 = vmatpush1.bf16.msra.mxu0 %v1502_v41 }
 0x11d   : > { %717 = vmatprep.subr.bf16.mxu0 %v1503_v42 }
 0x11e   : > { %408 = vadd.xlane.f32.xlu1 %v377_v14 }
 0x120   : > { %718 = vmatpush1.bf16.msra.mxu0 %v1506_v44 }
 0x18b   : > { %v379_v49 = vpop.xlane.xlu0 %378 }
 0x18c   : > { %v410_v50 = vmul.f32 0.0078125, %v379_v49 }
 0x18e   : > { %v426_v51 = vadd.f32 1e-05, %v410_v50 }
 0x18f   : > { %v381_v52 = vpop.xlane.xlu1 %380  ;;  %v383_v53 = vpop.xlane.xlu0 %382 }
 0x190   : > { %1508 = vrsqrt.f32 %v426_v51  ;;  %v411_v54 = vmul.f32 0.0078125, %v381_v52  ;;  %v412_v57 = vmul.f32 0.0078125, %v383_v53 }
 0x192   : > { %v427_v58 = vadd.f32 1e-05, %v411_v54  ;;  %v428_v59 = vadd.f32 1e-05, %v412_v57 }
 0x193   : > { %v385_v60 = vpop.xlane.xlu1 %384  ;;  %v387_v61 = vpop.xlane.xlu0 %386 }
 0x194   : > { %1510 = vrsqrt.f32 %v427_v58  ;;  %v413_v62 = vmul.f32 0.0078125, %v385_v60  ;;  %v414_v63 = vmul.f32 0.0078125, %v387_v61 }
 0x195   : > { %1512 = vrsqrt.f32 %v428_v59 }
 0x196   : > { %v429_v0 = vadd.f32 1e-05, %v413_v62  ;;  %v430_v1 = vadd.f32 1e-05, %v414_v63 }
 0x197   : > { %v389_v4 = vpop.xlane.xlu1 %388  ;;  %v391_v5 = vpop.xlane.xlu0 %390 }
 0x198   : > { %1514 = vrsqrt.f32 %v429_v0  ;;  %v415_v6 = vmul.f32 0.0078125, %v389_v4  ;;  %v416_v7 = vmul.f32 0.0078125, %v391_v5 }
 0x199   : > { %1516 = vrsqrt.f32 %v430_v1 }
 0x19a   : > { %v1509_v8 = vpop.eup %1508  ;;  %v431_v9 = vadd.f32 1e-05, %v415_v6  ;;  %v432_v16 = vadd.f32 1e-05, %v416_v7 }
 0x19b   : > { %v393_v17 = vpop.xlane.xlu1 %392  ;;  %v395_v18 = vpop.xlane.xlu0 %394  ;;  %v458_v19 = vmul.f32 %v1509_v8, %v1969_v24 }
 0x19c   : > { %1518 = vrsqrt.f32 %v431_v9  ;;  %v417_v20 = vmul.f32 0.0078125, %v393_v17  ;;  %v418_v21 = vmul.f32 0.0078125, %v395_v18 }
 0x19d   : > { %1520 = vrsqrt.f32 %v432_v16  ;;  %v480_v34 = vmul.f32 %v2047_v22, %v458_v19 }
 0x19e   : > { %v1511_v23 = vpop.eup %1510  ;;  %v433_v26 = vadd.f32 1e-05, %v417_v20  ;;  %v434_v27 = vadd.f32 1e-05, %v418_v21 }
 0x19f   : > { %v1513_v28 = vpop.eup %1512  ;;  %v397_v29 = vpop.xlane.xlu1 %396  ;;  %v459_v33 = vmul.f32 %v1511_v23, %v1975_v31  ;;  %v502_v45 = vadd.f32 %v2054_v15, %v480_v34 }
 0x1a0   : > { %v399_v30 = vpop.xlane.xlu0 %398  ;;  %1522 = vrsqrt.f32 %v433_v26  ;;  %v419_v24 = vmul.f32 0.0078125, %v397_v29  ;;  %v460_v35 = vmul.f32 %v1513_v28, %v1971_v25 }
 0x1a1   : > { %v420_v14 = vmul.f32 0.0078125, %v399_v30  ;;  %1524 = vrsqrt.f32 %v434_v27  ;;  %v481_v36 = vmul.f32 %v2047_v22, %v459_v33 }
 0x1a2   : > { %v1515_v37 = vpop.eup %1514  ;;  %v435_v38 = vadd.f32 1e-05, %v419_v24  ;;  %v482_v31 = vmul.f32 %v2047_v22, %v460_v35 }
 0x1a3   : > { %v436_v41 = vadd.f32 1e-05, %v420_v14  ;;  %v1517_v42 = vpop.eup %1516  ;;  %v401_v43 = vpop.xlane.xlu1 %400  ;;  %v503_v49 = vadd.f32 %v2054_v15, %v481_v36  ;;  %v461_v50 = vmul.f32 %v1515_v37, %v1977_v32 }
 0x1a4   : > { %v403_v44 = vpop.xlane.xlu0 %402  ;;  %1526 = vrsqrt.f32 %v435_v38  ;;  %v421_v51 = vmul.f32 0.0078125, %v401_v43  ;;  %v462_v54 = vmul.f32 %v1517_v42, %v1983_v39  ;;  %v504_v60 = vadd.f32 %v2054_v15, %v482_v31 }
 0x1a5   : > { %v422_v25 = vmul.f32 0.0078125, %v403_v44  ;;  %1528 = vrsqrt.f32 %v436_v41  ;;  %v518_v52 = vpack.c.bf16 %v503_v49, %v502_v45  ;;  %v483_v53 = vmul.f32 %v2047_v22, %v461_v50 }
 0x1a6   : > { %v1519_v57 = vpop.eup %1518  ;;  %v437_v58 = vadd.f32 1e-05, %v421_v51  ;;  %v484_v1 = vmul.f32 %v2047_v22, %v462_v54 }
 0x1a7   : > { %v438_v59 = vadd.f32 1e-05, %v422_v25  ;;  %v1521_v61 = vpop.eup %1520  ;;  %v405_v62 = vpop.xlane.xlu1 %404  ;;  %736 = vmatmul.mubr.bf16.vlgmr.msra.gmra.mrb[0].mxu0 %v518_v52  ;;  %1361 = vmatprep.mubr.bf16.mxu1 %v518_v52  ;;  %v505_v32 = vadd.f32 %v2054_v15, %v483_v53  ;;  %v463_v0 = vmul.f32 %v1519_v57, %v1985_v40 }
 0x1a8   : > { %v407_v63 = vpop.xlane.xlu0 %406  ;;  %1530 = vrsqrt.f32 %v437_v58  ;;  %v423_v4 = vmul.f32 0.0078125, %v405_v62  ;;  %745 = vmatprep.mubr.bf16.mxu0 %v1708_v46  ;;  %v464_v39 = vmul.f32 %v1521_v61, %v1991_v47  ;;  %v506_v19 = vadd.f32 %v2054_v15, %v484_v1 }
 0x1a9   : > { %v424_v5 = vmul.f32 0.0078125, %v407_v63  ;;  %1532 = vrsqrt.f32 %v438_v59  ;;  %v519_v6 = vpack.c.bf16 %v505_v32, %v504_v60  ;;  %v485_v7 = vmul.f32 %v2047_v22, %v463_v0 }
 0x1aa   : > { %v1523_v8 = vpop.eup %1522  ;;  %v439_v9 = vadd.f32 1e-05, %v423_v4  ;;  %v486_v17 = vmul.f32 %v2047_v22, %v464_v39 }
 0x1ab   : > { %v440_v16 = vadd.f32 1e-05, %v424_v5  ;;  %v1525_v18 = vpop.eup %1524  ;;  %v409_v40 = vpop.xlane.xlu1 %408  ;;  %1362 = vmatmul.mubr.bf16.vlgmr.msra.gmra.mrb[0].mxu1 %v519_v6  ;;  %v507_v20 = vadd.f32 %v2054_v15, %v485_v7  ;;  %v465_v21 = vmul.f32 %v1523_v8, %v1994_v48 }
 0x1ac   : > { %1534 = vrsqrt.f32 %v439_v9  ;;  %v425_v47 = vmul.f32 0.0078125, %v409_v40  ;;  %v466_v23 = vmul.f32 %v1525_v18, %v2001_v55  ;;  %v508_v30 = vadd.f32 %v2054_v15, %v486_v17 }
 0x1ad   : > { %1536 = vrsqrt.f32 %v440_v16  ;;  %v520_v26 = vpack.c.bf16 %v507_v20, %v506_v19  ;;  %v487_v27 = vmul.f32 %v2047_v22, %v465_v21 }
 0x1ae   : > { %v1527_v28 = vpop.eup %1526  ;;  %v441_v29 = vadd.f32 1e-05, %v425_v47  ;;  %v488_v48 = vmul.f32 %v2047_v22, %v466_v23 }
 0x1af   : > { %v1529_v33 = vpop.eup %1528  ;;  %746 = vmatmul.mubr.bf16.gmra.mrb[4].mxu0 %v519_v6  ;;  %1365 = vmatprep.mubr.bf16.mxu1 %v520_v26  ;;  %v509_v34 = vadd.f32 %v2054_v15, %v487_v27  ;;  %v467_v24 = vmul.f32 %v1527_v28, %v2004_v56 }
 0x1b0   : > { %1538 = vrsqrt.f32 %v441_v29  ;;  %755 = vmatprep.mubr.bf16.mxu0 %v1708_v46  ;;  %v468_v55 = vmul.f32 %v1529_v33, %v2011_v2  ;;  %v510_v41 = vadd.f32 %v2054_v15, %v488_v48 }
 0x1b1   : > { %v521_v14 = vpack.c.bf16 %v509_v34, %v508_v30  ;;  %v489_v35 = vmul.f32 %v2047_v22, %v467_v24 }
 0x1b2   : > { %v1531_v36 = vpop.eup %1530  ;;  %v490_v37 = vmul.f32 %v2047_v22, %v468_v55 }
 0x1b3   : > { %v1533_v38 = vpop.eup %1532  ;;  %1366 = vmatmul.mubr.bf16.gmra.mrb[4].mxu1 %v521_v14  ;;  %v511_v31 = vadd.f32 %v2054_v15, %v489_v35  ;;  %v469_v56 = vmul.f32 %v1531_v36, %v2014_v3 }
 0x1b4   : > { %v470_v42 = vmul.f32 %v1533_v38, %v2021_v10  ;;  %v512_v45 = vadd.f32 %v2054_v15, %v490_v37 }
 0x1b5   : > { %v522_v43 = vpack.c.bf16 %v511_v31, %v510_v41  ;;  %v491_v44 = vmul.f32 %v2047_v22, %v469_v56 }
 0x1b6   : > { %v1535_v2 = vpop.eup %1534  ;;  %v492_v25 = vmul.f32 %v2047_v22, %v470_v42 }
 0x1b7   : > { %v1537_v49 = vpop.eup %1536  ;;  %756 = vmatmul.mubr.bf16.gmra.mrb[8].mxu0 %v520_v26  ;;  %1369 = vmatprep.mubr.bf16.mxu1 %v522_v43  ;;  %v513_v50 = vadd.f32 %v2054_v15, %v491_v44  ;;  %v471_v51 = vmul.f32 %v1535_v2, %v2024_v11 }
 0x1b8   : > { %765 = vmatprep.mubr.bf16.mxu0 %v1708_v46  ;;  %v472_v3 = vmul.f32 %v1537_v49, %v2031_v12  ;;  %v514_v54 = vadd.f32 %v2054_v15, %v492_v25 }
 0x1b9   : > { %v523_v10 = vpack.c.bf16 %v513_v50, %v512_v45  ;;  %v493_v52 = vmul.f32 %v2047_v22, %v471_v51 }
 0x1ba   : > { %v1539_v53 = vpop.eup %1538  ;;  %v494_v59 = vmul.f32 %v2047_v22, %v472_v3 }
 0x1bb   : > { %1370 = vmatmul.mubr.bf16.gmra.mrb[8].mxu1 %v523_v10  ;;  %v515_v57 = vadd.f32 %v2054_v15, %v493_v52  ;;  %v473_v58 = vmul.f32 %v1539_v53, %v2034_v13  ;;  %v560_v13 = vlaneseq }
 0x1bc   : > { %v516_v12 = vadd.f32 %v2054_v15, %v494_v59 }
 0x1bd   : > { %v524_v11 = vpack.c.bf16 %v515_v57, %v514_v54  ;;  %v495_v60 = vmul.f32 %v2047_v22, %v473_v58  ;;  %v561_v22 = vshrl.u32 %v560_v13, 7 }
 0x1bf   : > { %766 = vmatmul.mubr.bf16.gmra.mrb[12].mxu0 %v521_v14  ;;  %1373 = vmatprep.mubr.bf16.mxu1 %v524_v11  ;;  %v517_v61 = vadd.f32 %v2054_v15, %v495_v60  ;;  %v562_v63 = vsub.s32 0, %v561_v22  ;;  %v558_v15 = vld [vmem:[%s2266_s4] sm:$0x7]  ;;  %v566_v32 = vsub.s32 1, %v561_v22  ;;  %v570_v1 = vsub.s32 2, %v561_v22 }
 0x1c0   : > { %775 = vmatprep.mubr.bf16.mxu0 %v1708_v46 }
 0x1c1   : > { %v525_v62 = vpack.c.bf16 %v517_v61, %v516_v12  ;;  %v2111_v0 = vrot.slane %v558_v15, %v562_v63  ;;  %v2113_v4 = vrot.slane %v558_v15, %v566_v32 }
 0x1c3   : > { %1374 = vmatmul.mubr.bf16.gmra.mrb[12].mxu1 %v525_v62 }
 0x1c7   : > { %776 = vmatmul.mubr.bf16.gmra.mrb[16].mxu0 %v522_v43 }
 0x1c8   : > { %785 = vmatprep.mubr.bf16.mxu0 %v1708_v46 }
 0x1cf   : > { %786 = vmatmul.mubr.bf16.gmra.mrb[20].mxu0 %v523_v10 }
 0x1d0   : > { %795 = vmatprep.mubr.bf16.mxu0 %v1708_v46 }
 0x1d7   : > { %796 = vmatmul.mubr.bf16.gmra.mrb[24].mxu0 %v524_v11 }
 0x1d8   : > { %805 = vmatprep.mubr.bf16.mxu0 %v1708_v46  ;;  %v2117_v46 = vrot.slane %v558_v15, %v570_v1 }
 0x1df   : > { %806 = vmatmul.mubr.bf16.gmra.mrb[28].mxu0 %v525_v62 }
 0x27a   : > { %v737_v5 = vpop.f32.mrb[0].mxu0 }
 0x27b   : > { %v738_v39 = vadd.f32 %v737_v5, %v2111_v0  ;;  %v739_v6 = vpop.f32.mrb[1].mxu0 }
 0x27c   : > { %v740_v7 = vadd.f32 %v739_v6, %v2113_v4  ;;  %v741_v8 = vpop.f32.mrb[2].mxu0 }
 0x27d   : > { %v742_v9 = vadd.f32 %v741_v8, %v2111_v0  ;;  %v743_v16 = vpop.f32.mrb[3].mxu0 }
 0x27e   : > { %v1297_v17 = vpack.c.bf16 %v740_v7, %v738_v39  ;;  %v744_v18 = vadd.f32 %v743_v16, %v2113_v4  ;;  %v1363_v40 = vpop.f32.mrb[0].mxu1 }
 0x27f   : > { %v859_v19 = vadd.f32 %v1363_v40, %v2117_v46  ;;  %v850_v20 = vpop.f32.mrb[1].mxu1 }
 0x280   : > { %1073 = vst [vmem:[%s2123_s18] sm:$0xff] %v1297_v17  ;;  %v1299_v21 = vpack.c.bf16 %v744_v18, %v742_v9  ;;  %v851_v47 = vadd.f32 %v850_v20, %v2117_v46  ;;  %v1364_v23 = vpop.f32.mrb[2].mxu1 }
 0x281   : > { %v1302_v26 = vpack.c.bf16 %v859_v19, %v859_v19  ;;  %v862_v27 = vadd.f32 %v1364_v23, %v2117_v46  ;;  %v853_v28 = vpop.f32.mrb[3].mxu1 }
 0x282   : > { %1075 = vst [vmem:[%s2123_s18 + $0xc] sm:$0xff] %v1299_v21  ;;  %v1298_v29 = vpack.c.bf16 %v851_v47, %v851_v47  ;;  %v854_v30 = vadd.f32 %v853_v28, %v2117_v46  ;;  %v747_v33 = vpop.f32.mrb[4].mxu0 }
 0x283   : > { %1078 = vst [vmem:[%s2123_s18 + $0x20] sm:$0xf] %v1302_v26  ;;  %v1304_v34 = vpack.c.bf16 %v862_v27, %v862_v27  ;;  %v748_v24 = vadd.f32 %v747_v33, %v2111_v0  ;;  %v749_v48 = vpop.f32.mrb[5].mxu0 }
 0x284   : > { %1074 = vst [vmem:[%s2123_s18 + $0x8] sm:$0xf] %v1298_v29  ;;  %v1300_v55 = vpack.c.bf16 %v854_v30, %v854_v30  ;;  %v750_v14 = vadd.f32 %v749_v48, %v2113_v4  ;;  %v751_v35 = vpop.f32.mrb[6].mxu0 }
 0x285   : > { %1080 = vst [vmem:[%s2123_s18 + $0x2c] sm:$0xf] %v1304_v34  ;;  %v752_v36 = vadd.f32 %v751_v35, %v2111_v0  ;;  %v753_v37 = vpop.f32.mrb[7].mxu0 }
 0x286   : > { %1076 = vst [vmem:[%s2123_s18 + $0x14] sm:$0xf] %v1300_v55  ;;  %v1301_v38 = vpack.c.bf16 %v750_v14, %v748_v24  ;;  %v754_v41 = vadd.f32 %v753_v37, %v2113_v4  ;;  %v1367_v31 = vpop.f32.mrb[4].mxu1 }
 0x287   : > { %v875_v56 = vadd.f32 %v1367_v31, %v2117_v46  ;;  %v866_v42 = vpop.f32.mrb[5].mxu1 }
 0x288   : > { %1077 = vst [vmem:[%s2123_s18 + $0x18] sm:$0xff] %v1301_v38  ;;  %v1303_v43 = vpack.c.bf16 %v754_v41, %v752_v36  ;;  %v867_v44 = vadd.f32 %v866_v42, %v2117_v46  ;;  %v1368_v2 = vpop.f32.mrb[6].mxu1 }
 0x289   : > { %v1310_v45 = vpack.c.bf16 %v875_v56, %v875_v56  ;;  %v878_v49 = vadd.f32 %v1368_v2, %v2117_v46  ;;  %v869_v50 = vpop.f32.mrb[7].mxu1 }
 0x28a   : > { %1079 = vst [vmem:[%s2123_s18 + $0x24] sm:$0xff] %v1303_v43  ;;  %v1306_v51 = vpack.c.bf16 %v867_v44, %v867_v44  ;;  %v870_v25 = vadd.f32 %v869_v50, %v2117_v46  ;;  %v757_v3 = vpop.f32.mrb[8].mxu0 }
 0x28b   : > { %1086 = vst [vmem:[%s2123_s18 + $0x50] sm:$0xf] %v1310_v45  ;;  %v1312_v10 = vpack.c.bf16 %v878_v49, %v878_v49  ;;  %v758_v52 = vadd.f32 %v757_v3, %v2111_v0  ;;  %v759_v53 = vpop.f32.mrb[9].mxu0 }
 0x28c   : > { %1082 = vst [vmem:[%s2123_s18 + $0x38] sm:$0xf] %v1306_v51  ;;  %v1308_v54 = vpack.c.bf16 %v870_v25, %v870_v25  ;;  %v760_v57 = vadd.f32 %v759_v53, %v2113_v4  ;;  %v761_v58 = vpop.f32.mrb[10].mxu0 }
 0x28d   : > { %1088 = vst [vmem:[%s2123_s18 + $0x5c] sm:$0xf] %v1312_v10  ;;  %v762_v59 = vadd.f32 %v761_v58, %v2111_v0  ;;  %v763_v11 = vpop.f32.mrb[11].mxu0 }
 0x28e   : > { %1084 = vst [vmem:[%s2123_s18 + $0x44] sm:$0xf] %v1308_v54  ;;  %v1305_v60 = vpack.c.bf16 %v760_v57, %v758_v52  ;;  %v764_v12 = vadd.f32 %v763_v11, %v2113_v4  ;;  %v1371_v61 = vpop.f32.mrb[8].mxu1 }
 0x28f   : > { %v891_v62 = vadd.f32 %v1371_v61, %v2117_v46  ;;  %v882_v13 = vpop.f32.mrb[9].mxu1 }
 0x290   : > { %1081 = vst [vmem:[%s2123_s18 + $0x30] sm:$0xff] %v1305_v60  ;;  %v1307_v22 = vpack.c.bf16 %v764_v12, %v762_v59  ;;  %v883_v63 = vadd.f32 %v882_v13, %v2117_v46  ;;  %v1372_v15 = vpop.f32.mrb[10].mxu1 }
 0x291   : > { %v1318_v32 = vpack.c.bf16 %v891_v62, %v891_v62  ;;  %v894_v1 = vadd.f32 %v1372_v15, %v2117_v46  ;;  %v885_v5 = vpop.f32.mrb[11].mxu1 }
 0x292   : > { %1083 = vst [vmem:[%s2123_s18 + $0x3c] sm:$0xff] %v1307_v22  ;;  %v1314_v39 = vpack.c.bf16 %v883_v63, %v883_v63  ;;  %v886_v6 = vadd.f32 %v885_v5, %v2117_v46  ;;  %v767_v7 = vpop.f32.mrb[12].mxu0 }
 0x293   : > { %1094 = vst [vmem:[%s2123_s18 + $0x80] sm:$0xf] %v1318_v32  ;;  %v1320_v8 = vpack.c.bf16 %v894_v1, %v894_v1  ;;  %v768_v9 = vadd.f32 %v767_v7, %v2111_v0  ;;  %v769_v16 = vpop.f32.mrb[13].mxu0 }
 0x294   : > { %1090 = vst [vmem:[%s2123_s18 + $0x68] sm:$0xf] %v1314_v39  ;;  %v1316_v17 = vpack.c.bf16 %v886_v6, %v886_v6  ;;  %v770_v18 = vadd.f32 %v769_v16, %v2113_v4  ;;  %v771_v40 = vpop.f32.mrb[14].mxu0 }
 0x295   : > { %1096 = vst [vmem:[%s2123_s18 + $0x8c] sm:$0xf] %v1320_v8  ;;  %v772_v19 = vadd.f32 %v771_v40, %v2111_v0  ;;  %v773_v20 = vpop.f32.mrb[15].mxu0 }
 0x296   : > { %1092 = vst [vmem:[%s2123_s18 + $0x74] sm:$0xf] %v1316_v17  ;;  %v1309_v21 = vpack.c.bf16 %v770_v18, %v768_v9  ;;  %v774_v47 = vadd.f32 %v773_v20, %v2113_v4  ;;  %v1375_v23 = vpop.f32.mrb[12].mxu1 }
 0x297   : > { %v907_v26 = vadd.f32 %v1375_v23, %v2117_v46  ;;  %v898_v27 = vpop.f32.mrb[13].mxu1 }
 0x298   : > { %1085 = vst [vmem:[%s2123_s18 + $0x48] sm:$0xff] %v1309_v21  ;;  %v1311_v28 = vpack.c.bf16 %v774_v47, %v772_v19  ;;  %v899_v29 = vadd.f32 %v898_v27, %v2117_v46  ;;  %v1376_v30 = vpop.f32.mrb[14].mxu1 }
 0x299   : > { %v1326_v33 = vpack.c.bf16 %v907_v26, %v907_v26  ;;  %v910_v34 = vadd.f32 %v1376_v30, %v2117_v46  ;;  %v901_v24 = vpop.f32.mrb[15].mxu1 }
 0x29a   : > { %1087 = vst [vmem:[%s2123_s18 + $0x54] sm:$0xff] %v1311_v28  ;;  %v1322_v48 = vpack.c.bf16 %v899_v29, %v899_v29  ;;  %v902_v55 = vadd.f32 %v901_v24, %v2117_v46  ;;  %v777_v14 = vpop.f32.mrb[16].mxu0 }
 0x29b   : > { %1102 = vst [vmem:[%s2123_s18 + $0xb0] sm:$0xf] %v1326_v33  ;;  %v1328_v35 = vpack.c.bf16 %v910_v34, %v910_v34  ;;  %v778_v36 = vadd.f32 %v777_v14, %v2111_v0  ;;  %v779_v37 = vpop.f32.mrb[17].mxu0 }
 0x29c   : > { %1098 = vst [vmem:[%s2123_s18 + $0x98] sm:$0xf] %v1322_v48  ;;  %v1324_v38 = vpack.c.bf16 %v902_v55, %v902_v55  ;;  %v780_v41 = vadd.f32 %v779_v37, %v2113_v4  ;;  %v781_v31 = vpop.f32.mrb[18].mxu0 }
 0x29d   : > { %1104 = vst [vmem:[%s2123_s18 + $0xbc] sm:$0xf] %v1328_v35  ;;  %v782_v56 = vadd.f32 %v781_v31, %v2111_v0  ;;  %v783_v42 = vpop.f32.mrb[19].mxu0 }
 0x29e   : > { %1100 = vst [vmem:[%s2123_s18 + $0xa4] sm:$0xf] %v1324_v38  ;;  %v1313_v46 = vpack.c.bf16 %v780_v41, %v778_v36  ;;  %v784_v43 = vadd.f32 %v783_v42, %v2113_v4 }
 0x2a0   : > { %1089 = vst [vmem:[%s2123_s18 + $0x60] sm:$0xff] %v1313_v46  ;;  %v1315_v44 = vpack.c.bf16 %v784_v43, %v782_v56 }
 0x2a2   : > { %1091 = vst [vmem:[%s2123_s18 + $0x6c] sm:$0xff] %v1315_v44  ;;  %v787_v2 = vpop.f32.mrb[20].mxu0 }
 0x2a3   : > { %v788_v45 = vadd.f32 %v787_v2, %v2111_v0  ;;  %v789_v49 = vpop.f32.mrb[21].mxu0 }
 0x2a4   : > { %v790_v50 = vadd.f32 %v789_v49, %v2113_v4  ;;  %v791_v51 = vpop.f32.mrb[22].mxu0 }
 0x2a5   : > { %v792_v25 = vadd.f32 %v791_v51, %v2111_v0  ;;  %v793_v3 = vpop.f32.mrb[23].mxu0 }
 0x2a6   : > { %v1317_v10 = vpack.c.bf16 %v790_v50, %v788_v45  ;;  %v794_v52 = vadd.f32 %v793_v3, %v2113_v4 }
 0x2a8   : > { %1093 = vst [vmem:[%s2123_s18 + $0x78] sm:$0xff] %v1317_v10  ;;  %v1319_v53 = vpack.c.bf16 %v794_v52, %v792_v25 }
 0x2aa   : > { %1095 = vst [vmem:[%s2123_s18 + $0x84] sm:$0xff] %v1319_v53  ;;  %v797_v54 = vpop.f32.mrb[24].mxu0 }
 0x2ab   : > { %v798_v57 = vadd.f32 %v797_v54, %v2111_v0  ;;  %v799_v58 = vpop.f32.mrb[25].mxu0 }
 0x2ac   : > { %v800_v59 = vadd.f32 %v799_v58, %v2113_v4  ;;  %v801_v11 = vpop.f32.mrb[26].mxu0 }
 0x2ad   : > { %v802_v60 = vadd.f32 %v801_v11, %v2111_v0  ;;  %v803_v12 = vpop.f32.mrb[27].mxu0 }
 0x2ae   : > { %v1321_v61 = vpack.c.bf16 %v800_v59, %v798_v57  ;;  %v804_v62 = vadd.f32 %v803_v12, %v2113_v4 }
 0x2b0   : > { %1097 = vst [vmem:[%s2123_s18 + $0x90] sm:$0xff] %v1321_v61  ;;  %v1323_v13 = vpack.c.bf16 %v804_v62, %v802_v60 }
 0x2b2   : > { %1099 = vst [vmem:[%s2123_s18 + $0x9c] sm:$0xff] %v1323_v13  ;;  %v807_v22 = vpop.f32.mrb[28].mxu0 }
 0x2b3   : > { %v808_v63 = vadd.f32 %v807_v22, %v2111_v0  ;;  %v809_v15 = vpop.f32.mrb[29].mxu0 }
 0x2b4   : > { %v810_v32 = vadd.f32 %v809_v15, %v2113_v4  ;;  %v811_v1 = vpop.f32.mrb[30].mxu0 }
 0x2b5   : > { %v812_v5 = vadd.f32 %v811_v1, %v2111_v0  ;;  %v813_v39 = vpop.f32.mrb[31].mxu0 }
 0x2b6   : > { %v1325_v6 = vpack.c.bf16 %v810_v32, %v808_v63  ;;  %v814_v7 = vadd.f32 %v813_v39, %v2113_v4 }
 0x2b8   : > { %1101 = vst [vmem:[%s2123_s18 + $0xa8] sm:$0xff] %v1325_v6  ;;  %v1327_v8 = vpack.c.bf16 %v814_v7, %v812_v5 }
 0x2ba   : > { %1103 = vst [vmem:[%s2123_s18 + $0xb4] sm:$0xff] %v1327_v8 }
 0x2bb   : > { %1611 = shalt.err (!%p1608_p7)
}
 0x2bc   : > { %s1612_s28 = scalar_lea.hbm %s2207_s12, 3072  ;;  %s1616_s16 = scalar_lea.hbm %s2299_s29, 12288 }
 0x2bd   : > { %p1613_p1 = scmp.ne.s32.totalorder %s2207_s12, %s1612_s28  ;;  %p1617_p5 = scmp.lt.u32.totalorder %s2207_s12, %s2299_s29 }
 0x2be   : > { %p1618_p9 = scmp.lt.u32.totalorder %s1616_s16, %s1612_s28  ;;  %p1620_p6 = scmp.lt.u32.totalorder %s1612_s28, %s2207_s12 }
 0x2bf   : > { %p1614_p2 = pnand %p1613_p1, %p1847_p11 }
 0x2c0   : > { %p1619_p0 = por %p1618_p9, %p1617_p5 }
 0x2c1   : > { %p1615_p4 = pneg %p1614_p2 }
 0x2c2   : > { %p1621_p8 = por %p1620_p6, %p1619_p0 }
 0x2c4   : > { %p1622_p10 = pnand %p1621_p8, %p1615_p4 }
 0x2c6   : > { %1625 = shalt.err (!%p1622_p10)
}
 0x2c7   : > { %s1710_s26 = smov 192   ;;  %s1711_s17 = smov 12  }
 0x2c8   : > { %1386 = dma.vmem_to_hbm [thread:$0]  (%p1847_p11), %s2201_s21, 3072, %s2207_s12, %s1106_s9, %s1710_s26, %s1710_s26, %s1711_s17  }
 0x2c9 PF: > { %s2300_s27 = sld [smem:[#allocation11_spill]]  ;;  %s2301_s22 = sld [smem:[#allocation13_spill]] }
 0x2ca   : > { %p1403_p12 = scmp.ge.s32.totalorder %s1700_s25, 2 }
 0x2cf   : > { %s1137_s8 = sand.u32 1, %s2300_s27   ;;  %p2302_p13 = scmp.ne.s32.totalorder %s2301_s22, 0 }
 0x2d0   : > { %s1138_s11 = scalar_lea.sflag [#allocation4], %s1137_s8 }
 0x2d1   : > { %p1397_p3 = pnand %p1403_p12, %p2302_p13 }
 0x2d3   : > { %1667 = dma.done.wait (!%p1397_p3), %s1138_s11, 3072  }
 0x2d4   : > { %1669 = vsyncadd (!%p1397_p3), %s1138_s11, 4294964224  ;;  %s22_s25 = sadd.s32 1, %s1700_s25   ;;  %s2303_s21 = sld [smem:[#allocation12_spill]] }
 0x2d5   : > { %p19_p7 = scmp.ge.s32.totalorder %s22_s25, 6   ;;  %s2304_s23 = sld [smem:[#allocation14_spill]] }
 0x2d6   : > { %s2305_s10 = sld [smem:[#allocation15_spill]]  ;;  %s2306_s18 = smov %s1676_s19 }
 0x2d7   : > { %s2307_s19 = smov %s1680_s20  ;;  %s2308_s20 = smov %s1864_s13 }
 0x2d8   : > { %s2309_s22 = smov %s1696_s24  ;;  %21 = sbr.rel (!%p19_p7) target bundleno = 11 (0xb), region = 89 }
 0x2dc   : > { %s2310_s24 = smov %s2305_s10 }
 0x2df   :  { %1143 = vsyncpa [#allocation3], 1 }
 0x2e0   :  { %1145 = vsyncpa [#allocation3 + $0x1], 1 }
 0x2e1   :  { %1146 = vsyncpa [#allocation6], 1 }
 0x2e2   :  { %1147 = vsyncpa [#allocation4], 1 }
 0x2e3   :  { %1149 = vsyncpa [#allocation4 + $0x1], 1 }

</bundles_post_ra>
